<compile_context>
chip_gen: v7x
topology: tpu7x:2x2x1
jax: 0.10.0
libtpu: 0.0.40
codegen_flags: <defaults>
</compile_context>

<pallas_src>
import functools
import numpy as np
import jax
import jax.numpy as jnp
from jax.experimental import pallas as pl
from jax.experimental.pallas import tpu as pltpu


def _ru(x, m):
    return ((x + m - 1) // m) * m


# --------------------------- nearest-upsample kernel -------------------------

def _upsample_nearest_kernel(x_ref, o_ref, *, s):
    # x_ref: (th, W, C)   o_ref: (th, s, W, s, C)
    th, W, C = x_ref.shape
    x = x_ref[...]
    o_ref[...] = jnp.broadcast_to(
        x[:, None, :, None, :], (th, s, W, s, C)).astype(o_ref.dtype)


def _upsample_nearest_add_kernel(x_ref, r_ref, o_ref, *, s):
    # Fused UpLayer + residual add (PSPNet cross pattern): add in f32.
    th, W, C = x_ref.shape
    x = x_ref[...]
    y = jnp.broadcast_to(x[:, None, :, None, :], (th, s, W, s, C))
    o_ref[...] = (y.astype(jnp.float32)
                  + r_ref[...].astype(jnp.float32)).astype(o_ref.dtype)


def _pick_rows(M, W, C, s, itemsize, has_res):
    """Input-row block size: biggest block within ~4MiB of VMEM (double-buffered
    in + out [+ residual]), and keep >=2 blocks so the parallel grid axis can be
    sharded across two TensorCores on v7x (per review)."""
    per_row = W * C * (1 + (1 + int(has_res)) * s * s) * itemsize * 2
    th = max(1, min(M, (4 * 1024 * 1024) // max(per_row, 1)))
    while M % th:
        th -= 1
    if th == M and M % 2 == 0:
        th = M // 2
    return th


@functools.partial(jax.jit, static_argnames=("scale",))
def upsample_nearest_nhwc(x, *, scale, residual=None):
    """Nearest-neighbor upsample by integer `scale` on NHWC, with an optional
    fused add of `residual` (at output resolution).  Returns NHWC, dtype of x."""
    s = int(scale)
    B, H, W, C = x.shape
    if s == 1:
        return x if residual is None else (x + residual.astype(x.dtype))
    has_res = residual is not None
    M = B * H
    th = _pick_rows(M, W, C, s, jnp.dtype(x.dtype).itemsize, has_res)

    x3 = x.reshape(M, W, C)                      # free: merge of leading dims
    in_specs = [pl.BlockSpec((th, W, C), lambda i: (i, 0, 0))]
    inputs = [x3]
    if has_res:
        # (B, H*s, W*s, C) -> (M, s, W, s, C): pure row-major split/merge (free).
        r5 = residual.reshape(M, s, W, s, C)
        in_specs.append(pl.BlockSpec((th, s, W, s, C),
                                     lambda i: (i, 0, 0, 0, 0)))
        inputs.append(r5)
        kernel = functools.partial(_upsample_nearest_add_kernel, s=s)
    else:
        kernel = functools.partial(_upsample_nearest_kernel, s=s)

    out5 = pl.pallas_call(
        kernel,
        out_shape=jax.ShapeDtypeStruct((M, s, W, s, C), x.dtype),
        grid=(M // th,),
        in_specs=in_specs,
        out_specs=pl.BlockSpec((th, s, W, s, C), lambda i: (i, 0, 0, 0, 0)),
        compiler_params=pltpu.CompilerParams(
            dimension_semantics=("parallel",)),
    )(*inputs)
    # (M, s, W, s, C) -> (B, H*s, W*s, C): pure row-major merge (free).
    return out5.reshape(B, H * s, W * s, C)


def upsample_nearest_add_nchw(x, scale, residual):
    """UpLayer('nearest', scale)(x) + residual, fused in one Pallas kernel.
    x: (B,C,H,W); residual: (B,C,H*scale,W*scale).  Returns NCHW."""
    xh = jnp.transpose(x, (0, 2, 3, 1))
    rh = jnp.transpose(residual, (0, 2, 3, 1))
    yh = upsample_nearest_nhwc(xh, scale=scale, residual=rh)
    return jnp.transpose(yh, (0, 3, 1, 2))


# ------------------------------- MXU matmul kernel ----------------------------
# Used for uptype='deconv' (ConvTranspose2d(feats, feats, 2, 2)).

def _matmul_bias_kernel(x_ref, w_ref, b_ref, o_ref, acc_ref):
    k = pl.program_id(2)

    @pl.when(k == 0)
    def _():
        acc_ref[...] = jnp.zeros_like(acc_ref)

    acc_ref[...] += jnp.dot(x_ref[...], w_ref[...],
                            preferred_element_type=jnp.float32)

    @pl.when(k == pl.num_programs(2) - 1)
    def _():
        o_ref[...] = (acc_ref[...] + b_ref[...]).astype(o_ref.dtype)


def _pick_tile(n, cap):
    """Largest tile <= cap that divides n (n is a multiple of 128)."""
    t = min(n, cap)
    while n % t:
        t -= 128
    return max(t, 128)


def _matmul_bias(x, wp, bp, out_n):
    """out = x @ wp + bp.  x:(M,K); wp:(Kp,Np) bf16 pre-padded; bp:(1,Np) f32.
    bf16 MXU operands, f32 accumulation; output f32 sliced to (M, out_n)."""
    M, K = x.shape
    Kp, Np = wp.shape
    tm = 256 if M >= 256 else (128 if M >= 128 else _ru(M, 8))
    tn = _pick_tile(Np, 512)
    tk = _pick_tile(Kp, 2048)      # collapse K grid when it fits VMEM (review)
    Mp = _ru(M, tm)
    xp = jnp.pad(x.astype(jnp.bfloat16), ((0, Mp - M), (0, Kp - K)))

    out = pl.pallas_call(
        _matmul_bias_kernel,
        out_shape=jax.ShapeDtypeStruct((Mp, Np), jnp.float32),
        grid_spec=pltpu.PrefetchScalarGridSpec(
            num_scalar_prefetch=0,
            grid=(Mp // tm, Np // tn, Kp // tk),
            in_specs=[pl.BlockSpec((tm, tk), lambda i, j, k: (i, k)),
                      pl.BlockSpec((tk, tn), lambda i, j, k: (k, j)),
                      pl.BlockSpec((1, tn), lambda i, j, k: (0, j))],
            out_specs=pl.BlockSpec((tm, tn), lambda i, j, k: (i, j)),
            scratch_shapes=[pltpu.VMEM((tm, tn), jnp.float32)]),
        compiler_params=pltpu.CompilerParams(
            dimension_semantics=("parallel", "parallel", "arbitrary"),
            # safe on every generation (<= 64 MiB physical VMEM on v7x)
            vmem_limit_bytes=32 * 1024 * 1024),
    )(xp, wp, bp)
    return out[:M, :out_n]


def _prep_deconv(w, b):
    """Fold ConvTranspose2d(k=2, s=2) weights into a pre-padded bf16 matmul
    weight of shape (Kp, Np) with columns ordered (p, q, cout), done once."""
    cin, cout = w.shape[0], w.shape[1]
    wm = jnp.transpose(w, (0, 2, 3, 1)).reshape(cin, 4 * cout)   # (Cin, p*q*Cout)
    bm = jnp.tile(b, 4)                                          # bias per (p,q,o)
    Kp, Np = _ru(cin, 128), _ru(4 * cout, 128)
    wp = jnp.pad(wm, ((0, Kp - cin), (0, Np - 4 * cout))).astype(jnp.bfloat16)
    bp = jnp.pad(bm, (0, Np - 4 * cout)).reshape(1, Np).astype(jnp.float32)
    return {"wm": wp, "b": bp, "cin": cin, "cout": cout}


def deconv2x2_forward(prep, x_nchw):
    """ConvTranspose2d(feats, feats, kernel_size=2, stride=2) on NCHW input."""
    B, C, H, W = x_nchw.shape
    cout = prep["cout"]
    xh = jnp.transpose(x_nchw, (0, 2, 3, 1)).reshape(B * H * W, C)
    y = _matmul_bias(xh, prep["wm"], prep["b"], out_n=4 * cout)   # (M, 4*cout)
    y = y.reshape(B, H, W, 2, 2, cout)
    y = jnp.transpose(y, (0, 1, 3, 2, 4, 5)).reshape(B, 2 * H, 2 * W, cout)
    return jnp.transpose(y, (0, 3, 1, 2))


# ------------------------------- module interface ----------------------------

def init_up_layer(key, feats=None, uptype='nearest', scale=2):
    """Mirror of UpLayer.__init__."""
    params = {"uptype": uptype, "scale": int(scale)}
    if uptype == 'deconv':
        k1, k2 = jax.random.split(key)
        fan_in = feats * 2 * 2
        w = jax.random.normal(k1, (feats, feats, 2, 2), jnp.float32) \
            * np.sqrt(1.0 / fan_in)
        bound = 1.0 / np.sqrt(fan_in)
        b = jax.random.uniform(k2, (feats,), jnp.float32, -bound, bound)
        params["w"], params["b"] = w, b
        params["prep"] = _prep_deconv(w, b)          # one-time prep (review)
    return params


def up_layer_forward(params, x, prev=None):
    """UpLayer.forward: x (B,C,H,W) -> (B,C,H*scale,W*scale). `prev` ignored."""
    del prev
    uptype, s = params["uptype"], params["scale"]
    if uptype == 'deconv':
        # TODO(synk): deconv mode hard-codes kernel_size=2/stride=2 (scale 2),
        # exactly as the PyTorch module does.
        return deconv2x2_forward(params["prep"], x)
    if uptype == 'nearest':
        xh = jnp.transpose(x, (0, 2, 3, 1))
        yh = upsample_nearest_nhwc(xh, scale=s)
        return jnp.transpose(yh, (0, 3, 1, 2))
    # TODO(synk): F.interpolate modes other than 'nearest' (e.g. 'bilinear')
    # are not implemented as Pallas kernels.
    raise NotImplementedError(f"uptype={uptype!r}")


def _deconv_ref(x, w, b):
    """Pure-JAX reference for ConvTranspose2d(k=2, s=2)."""
    B, _, H, W = x.shape
    cout = w.shape[1]
    y = jnp.einsum('bchw,copq->bohpwq', x, w).reshape(B, cout, 2 * H, 2 * W)
    return y + b[None, :, None, None]


# ----------------------------------- main -------------------------------------

if __name__ == "__main__":
    key = jax.random.PRNGKey(0)
    kx, kr, kd = jax.random.split(key, 3)
    B, C, H, W = 2, 4, 16, 16
    x = jax.random.normal(kx, (B, C, H, W), jnp.float32)

    # --- default module config: uptype='nearest', scale=2 --------------------
    layer = init_up_layer(kx, uptype='nearest', scale=2)
    y = jax.block_until_ready(up_layer_forward(layer, x))
    ref = jnp.repeat(jnp.repeat(x, 2, axis=2), 2, axis=3)
    assert y.shape == (B, C, 2 * H, 2 * W), y.shape
    assert bool(jnp.allclose(y, ref, atol=1e-6))

    # --- generic integer scale (scale=4) --------------------------------------
    layer4 = init_up_layer(kx, uptype='nearest', scale=4)
    y4 = jax.block_until_ready(up_layer_forward(layer4, x))
    ref4 = jnp.repeat(jnp.repeat(x, 4, axis=2), 4, axis=3)
    assert y4.shape == (B, C, 4 * H, 4 * W), y4.shape
    assert bool(jnp.allclose(y4, ref4, atol=1e-6))

    # --- fused UpLayer + add (PSPNet cross pattern, per perf review) ----------
    res = jax.random.normal(kr, (B, C, 2 * H, 2 * W), jnp.float32)
    yf = jax.block_until_ready(upsample_nearest_add_nchw(x, 2, res))
    assert bool(jnp.allclose(yf, ref + res, atol=1e-5))

    # --- deconv mode -----------------------------------------------------------
    layer_d = init_up_layer(kd, feats=C, uptype='deconv', scale=2)
    yd = jax.block_until_ready(up_layer_forward(layer_d, x))
    refd = _deconv_ref(x, layer_d["w"], layer_d["b"])
    assert yd.shape == (B, C, 2 * H, 2 * W), yd.shape
    assert bool(jnp.allclose(yd, refd, atol=2e-2, rtol=2e-2))   # bf16 MXU ops

    print("KERNEL_OK")
</pallas_src>

<mosaic_0001>
module attributes {stable_mosaic.version = 11 : i64} {
  func.func @_upsample_nearest_kernel(%arg0: i32, %arg1: memref<16x16x4xf32, #tpu.memory_space<vmem>>, %arg2: memref<16x2x16x2x4xf32, #tpu.memory_space<vmem>>) attributes {dimension_semantics = [#tpu.dimension_semantics<parallel>], iteration_bounds = array<i64: 2>, scalar_prefetch = 0 : i64, scratch_operands = 0 : i64, tpu.core_type = #tpu.core_type<tc>, window_params = [{transform_indices = @transform_0, window_bounds = array<i64: 16, 16, 4>}, {transform_indices = @transform_1, window_bounds = array<i64: 16, 2, 16, 2, 4>}]} {
    %c0 = arith.constant 0 : index
    %c0_0 = arith.constant 0 : index
    %c0_1 = arith.constant 0 : index
    %0 = vector.load %arg1[%c0, %c0_0, %c0_1] : memref<16x16x4xf32, #tpu.memory_space<vmem>>, vector<16x16x4xf32>
    %1 = vector.shape_cast %0 : vector<16x16x4xf32> to vector<16x1x16x1x4xf32>
    %2 = vector.shape_cast %1 : vector<16x1x16x1x4xf32> to vector<16x1x16x1x4xf32>
    %3 = vector.broadcast %2 : vector<16x1x16x1x4xf32> to vector<16x2x16x2x4xf32>
    %c0_2 = arith.constant 0 : index
    %c0_3 = arith.constant 0 : index
    %c0_4 = arith.constant 0 : index
    %c0_5 = arith.constant 0 : index
    %c0_6 = arith.constant 0 : index
    %4 = vector.load %arg2[%c0_2, %c0_3, %c0_4, %c0_5, %c0_6] : memref<16x2x16x2x4xf32, #tpu.memory_space<vmem>>, vector<16x2x16x2x4xf32>
    tpu.vector_store %arg2[%c0_2, %c0_3, %c0_4, %c0_5, %c0_6], %3 {strides = array<i32>} : memref<16x2x16x2x4xf32, #tpu.memory_space<vmem>>, vector<16x2x16x2x4xf32>,
    return
  }
  func.func @transform_0(%arg0: i32) -> (i32, i32, i32) {
    %c0_i32 = arith.constant 0 : i32
    %c0_i32_0 = arith.constant 0 : i32
    %c0_i32_1 = arith.constant 0 : i32
    return %arg0, %c0_i32, %c0_i32_0 : i32, i32, i32
  }
  func.func @transform_1(%arg0: i32) -> (i32, i32, i32, i32, i32) {
    %c0_i32 = arith.constant 0 : i32
    %c0_i32_0 = arith.constant 0 : i32
    %c0_i32_1 = arith.constant 0 : i32
    %c0_i32_2 = arith.constant 0 : i32
    %c0_i32_3 = arith.constant 0 : i32
    return %arg0, %c0_i32, %c0_i32_0, %c0_i32_1, %c0_i32_2 : i32, i32, i32, i32, i32
  }
}

</mosaic_0001>

<bundles_post_ra>
// kernel: upsample_nearest_nhwc.1
= control target key start
LH: loop header
LB: loop body
LE: loop exit
PB: predicated region body
PF: predicated region fallthrough
CT: control target
= control target key end

     0   :  { %s3651_s6 = smov 0   ;;  %s5291_s0 = inlined_call_operand.vmem [shape: f32[32,16,4], index: 0, kind: input, shape index: {}]   ;;  %s5292_s1 = inlined_call_operand.vmem [shape: f32[32,2,16,2,4], index: 1, kind: output, shape index: {}]  }
   0x1 LB: > { %s3608_s7 = sadd.s32 4294967295, %s3638_s6   ;;  %p3612_p0 = scmp.ge.s32.totalorder %s3638_s6, 1  ;;  %s3638_s6 = sphi %s3651_s6, %s11_s6  }
   0x2   : > { %p89_p1 = scmp.lt.s32.totalorder %s3638_s6, 3 }
   0x4   : > { %p90_p2 = pnand %p3612_p0, %p89_p1 }
   0x5   : > { %s3613_s8 = sshll.u32 (!%p90_p2), %s3608_s7, 4  ;;  %v193_v0 = vlaneseq (!%p90_p2)  ;;  %v3640_v1 = vmov (!%p90_p2), 1966171168   ;;  %vm3037_vm0 = vcmask (!%p90_p2), 25600  }
   0x6   : > { %93 = sbr.rel (%p90_p2) target bundleno = 279 (0x117), region = 24  ;;  %p112_p3 = scmp.lt.s32.totalorder (!%p90_p2), %s3613_s8, 31  ;;  %v191_v2 = vunpack.c.l.s4 (!%p90_p2), %v3640_v1 }
   0x7   : > { %v194_v3 = vshrl.u32 (!%p90_p2), %v193_v0, 7 }
   0x8   : > { %v192_v4 = vunpack.c.0.s8 (!%p90_p2), %v191_v2 }
   0x9   : > { %v3667_v7 = vsub.s32 (!%p90_p2), 0, %v194_v3 }
   0xa   : > { %v3659_v5 = vsub.s32 (!%p90_p2), %v192_v4, %v194_v3 }
   0xd   : > { %s5294_s8 = smov (!%p112_p3, %s3613_s8), 31 }
   0xe   : > { %s3621_s9 = sshll.u32 %s5294_s8, 4  ;;  %s3622_s13 = sshll.u32 %s5294_s8, 6 }
   0xf   : > { %s3664_s12 = scalar_lea.vmem %s5291_s0, %s3621_s9  ;;  %s3696_s16 = scalar_lea.vmem %s5292_s1, %s3622_s13 }
  0x10   : > { %v125_v6 = vld [vmem:[%s3664_s12] sm:$0xff]  ;;  %v126_v8 = vld [vmem:[%s3664_s12 + $0x8] sm:$0xff]  ;;  %v3671_v9 = vld [vmem:[%s3664_s12 + $0x10] sm:$0xff] }
  0x11   : > { %v196_v10 = vrot.slane %v125_v6, %v3659_v5  ;;  %v189_v11 = vcombine.high %v125_v6, %v125_v6  ;;  %v245_v12 = vrot.slane %v126_v8, %v3659_v5  ;;  %v238_v13 = vcombine.high %v126_v8, %v126_v8  ;;  %v3676_v14 = vld [vmem:[%s3664_s12 + $0x18] sm:$0xff] }
  0x12   : > { %v3680_v15 = vrot.slane %v3671_v9, %v3659_v5  ;;  %v287_v16 = vcombine.high %v3671_v9, %v3671_v9  ;;  %v3686_v17 = vrot.slane %v3676_v14, %v3659_v5  ;;  %v336_v18 = vcombine.high %v3676_v14, %v3676_v14  ;;  %v129_v9 = vld [vmem:[%s3664_s12 + $0x20] sm:$0xff] }
  0x13   : > { %v212_v19 = vrot.slane %v196_v10, %v3659_v5  ;;  %v204_v20 = vcombine.high %v196_v10, %v196_v10  ;;  %v203_v21 = vrot.slane %v189_v11, %v3659_v5  ;;  %v261_v22 = vrot.slane %v245_v12, %v3659_v5 }
  0x14   : > { %v253_v23 = vcombine.high %v245_v12, %v245_v12  ;;  %v252_v24 = vrot.slane %v238_v13, %v3659_v5  ;;  %v3701_v25 = vrot.slane %v3680_v15, %v3659_v5  ;;  %v302_v26 = vcombine.high %v3680_v15, %v3680_v15 }
  0x15   : > { %v1760_v27 = vrot.slane %v212_v19, %v3667_v7  ;;  %v226_v28 = vrot.slane %v204_v20, %v3659_v5  ;;  %v234_v29 = vcombine.high %v212_v19, %v212_v19  ;;  %v219_v30 = vrot.slane %v203_v21, %v3659_v5  ;;  %v3835_v20 = vld [vmem:[%s3664_s12 + $0x28] sm:$0xff] }
  0x16   : > { %v205_v31 = vcombine.high %v203_v21, %v203_v21  ;;  %v1792_v32 = vrot.slane %v261_v22, %v3667_v7  ;;  %v275_v33 = vrot.slane %v253_v23, %v3659_v5  ;;  %v283_v34 = vcombine.high %v261_v22, %v261_v22 }
  0x17   : > { %3038 = vst.msk [vmem:[%s3696_s16] sm:$0x3] %vm3037_vm0, %v1760_v27  ;;  %3054 = vst.msk [vmem:[%s3696_s16 + $0x20] sm:$0x3] %vm3037_vm0, %v1760_v27  ;;  %v1764_v35 = vrot.slane %v226_v28, %v3667_v7  ;;  %v1768_v36 = vrot.slane %v234_v29, %v3667_v7  ;;  %v236_v37 = vcombine.high %v226_v28, %v226_v28 }
  0x18   : > { %v1776_v38 = vrot.slane %v219_v30, %v3667_v7  ;;  %v233_v39 = vrot.slane %v205_v31, %v3659_v5  ;;  %v235_v40 = vcombine.high %v219_v30, %v219_v30  ;;  %3046 = vst.msk [vmem:[%s3696_s16 + $0x10] sm:$0x3] %vm3037_vm0, %v1792_v32  ;;  %3062 = vst.msk [vmem:[%s3696_s16 + $0x30] sm:$0x3] %vm3037_vm0, %v1792_v32 }
  0x19   : > { %v1796_v41 = vrot.slane %v275_v33, %v3667_v7  ;;  %v1800_v42 = vrot.slane %v283_v34, %v3667_v7  ;;  %3039 = vst.msk [vmem:[%s3696_s16 + $0x2] sm:$0x3] %vm3037_vm0, %v1764_v35  ;;  %3055 = vst.msk [vmem:[%s3696_s16 + $0x22] sm:$0x3] %vm3037_vm0, %v1764_v35  ;;  %v1772_v43 = vrot.slane %v236_v37, %v3667_v7 }
  0x1a   : > { %3040 = vst.msk [vmem:[%s3696_s16 + $0x4] sm:$0x3] %vm3037_vm0, %v1768_v36  ;;  %3056 = vst.msk [vmem:[%s3696_s16 + $0x24] sm:$0x3] %vm3037_vm0, %v1768_v36  ;;  %v285_v44 = vcombine.high %v275_v33, %v275_v33  ;;  %v268_v45 = vrot.slane %v252_v24, %v3659_v5  ;;  %v254_v46 = vcombine.high %v252_v24, %v252_v24 }
  0x1b   : > { %3042 = vst.msk [vmem:[%s3696_s16 + $0x8] sm:$0x3] %vm3037_vm0, %v1776_v38  ;;  %3058 = vst.msk [vmem:[%s3696_s16 + $0x28] sm:$0x3] %vm3037_vm0, %v1776_v38  ;;  %v1780_v47 = vrot.slane %v233_v39, %v3667_v7  ;;  %v1784_v48 = vrot.slane %v235_v40, %v3667_v7  ;;  %v237_v49 = vcombine.high %v233_v39, %v233_v39 }
  0x1c   : > { %3047 = vst.msk [vmem:[%s3696_s16 + $0x12] sm:$0x3] %vm3037_vm0, %v1796_v41  ;;  %3063 = vst.msk [vmem:[%s3696_s16 + $0x32] sm:$0x3] %vm3037_vm0, %v1796_v41  ;;  %v1824_v50 = vrot.slane %v3701_v25, %v3667_v7  ;;  %v1804_v51 = vrot.slane %v285_v44, %v3667_v7  ;;  %v1808_v52 = vrot.slane %v268_v45, %v3667_v7 }
  0x1d   : > { %3048 = vst.msk [vmem:[%s3696_s16 + $0x14] sm:$0x3] %vm3037_vm0, %v1800_v42  ;;  %3064 = vst.msk [vmem:[%s3696_s16 + $0x34] sm:$0x3] %vm3037_vm0, %v1800_v42  ;;  %v282_v53 = vrot.slane %v254_v46, %v3659_v5  ;;  %v284_v54 = vcombine.high %v268_v45, %v268_v45  ;;  %v1788_v55 = vrot.slane %v237_v49, %v3667_v7 }
  0x1e   : > { %3041 = vst.msk [vmem:[%s3696_s16 + $0x6] sm:$0x3] %vm3037_vm0, %v1772_v43  ;;  %3057 = vst.msk [vmem:[%s3696_s16 + $0x26] sm:$0x3] %vm3037_vm0, %v1772_v43  ;;  %v324_v56 = vrot.slane %v302_v26, %v3659_v5  ;;  %v332_v57 = vcombine.high %v3701_v25, %v3701_v25  ;;  %v301_v58 = vrot.slane %v287_v16, %v3659_v5 }
  0x1f   : > { %3043 = vst.msk [vmem:[%s3696_s16 + $0xa] sm:$0x3] %vm3037_vm0, %v1780_v47  ;;  %3059 = vst.msk [vmem:[%s3696_s16 + $0x2a] sm:$0x3] %vm3037_vm0, %v1780_v47  ;;  %v1812_v59 = vrot.slane %v282_v53, %v3667_v7  ;;  %v1816_v60 = vrot.slane %v284_v54, %v3667_v7  ;;  %v286_v61 = vcombine.high %v282_v53, %v282_v53 }
  0x20   : > { %3044 = vst.msk [vmem:[%s3696_s16 + $0xc] sm:$0x3] %vm3037_vm0, %v1784_v48  ;;  %3060 = vst.msk [vmem:[%s3696_s16 + $0x2c] sm:$0x3] %vm3037_vm0, %v1784_v48  ;;  %v359_v62 = vrot.slane %v3686_v17, %v3659_v5  ;;  %v1828_v63 = vrot.slane %v324_v56, %v3667_v7  ;;  %v1832_v0 = vrot.slane %v332_v57, %v3667_v7 }
  0x21   : > { %3070 = vst.msk [vmem:[%s3696_s16 + $0x40] sm:$0x3] %vm3037_vm0, %v1824_v50  ;;  %3086 = vst.msk [vmem:[%s3696_s16 + $0x60] sm:$0x3] %vm3037_vm0, %v1824_v50  ;;  %v334_v1 = vcombine.high %v324_v56, %v324_v56  ;;  %v317_v2 = vrot.slane %v301_v58, %v3659_v5  ;;  %v1820_v3 = vrot.slane %v286_v61, %v3667_v7 }
  0x22   : > { %3049 = vst.msk [vmem:[%s3696_s16 + $0x16] sm:$0x3] %vm3037_vm0, %v1804_v51  ;;  %3065 = vst.msk [vmem:[%s3696_s16 + $0x36] sm:$0x3] %vm3037_vm0, %v1804_v51  ;;  %v303_v4 = vcombine.high %v301_v58, %v301_v58  ;;  %v1856_v6 = vrot.slane %v359_v62, %v3667_v7  ;;  %v351_v8 = vcombine.high %v3686_v17, %v3686_v17 }
  0x23   : > { %3050 = vst.msk [vmem:[%s3696_s16 + $0x18] sm:$0x3] %vm3037_vm0, %v1808_v52  ;;  %3066 = vst.msk [vmem:[%s3696_s16 + $0x38] sm:$0x3] %vm3037_vm0, %v1808_v52  ;;  %v1836_v10 = vrot.slane %v334_v1, %v3667_v7  ;;  %v1840_v11 = vrot.slane %v317_v2, %v3667_v7  ;;  %v333_v12 = vcombine.high %v317_v2, %v317_v2 }
  0x24   : > { %3045 = vst.msk [vmem:[%s3696_s16 + $0xe] sm:$0x3] %vm3037_vm0, %v1788_v55  ;;  %3061 = vst.msk [vmem:[%s3696_s16 + $0x2e] sm:$0x3] %vm3037_vm0, %v1788_v55  ;;  %v381_v13 = vcombine.high %v359_v62, %v359_v62  ;;  %v331_v15 = vrot.slane %v303_v4, %v3659_v5  ;;  %v373_v16 = vrot.slane %v351_v8, %v3659_v5  ;;  %v131_v55 = vld [vmem:[%s3664_s12 + $0x30] sm:$0xff] }
  0x25   : > { %3051 = vst.msk [vmem:[%s3696_s16 + $0x1a] sm:$0x3] %vm3037_vm0, %v1812_v59  ;;  %3067 = vst.msk [vmem:[%s3696_s16 + $0x3a] sm:$0x3] %vm3037_vm0, %v1812_v59  ;;  %v350_v17 = vrot.slane %v336_v18, %v3659_v5  ;;  %v392_v19 = vrot.slane %v129_v9, %v3659_v5  ;;  %v1848_v21 = vrot.slane %v333_v12, %v3667_v7 }
  0x26   : > { %3052 = vst.msk [vmem:[%s3696_s16 + $0x1c] sm:$0x3] %vm3037_vm0, %v1816_v60  ;;  %3068 = vst.msk [vmem:[%s3696_s16 + $0x3c] sm:$0x3] %vm3037_vm0, %v1816_v60  ;;  %v1864_v14 = vrot.slane %v381_v13, %v3667_v7  ;;  %v385_v18 = vcombine.high %v129_v9, %v129_v9  ;;  %v3849_v22 = vrot.slane %v3835_v20, %v3659_v5 }
  0x27   : > { %3071 = vst.msk [vmem:[%s3696_s16 + $0x42] sm:$0x3] %vm3037_vm0, %v1828_v63  ;;  %3087 = vst.msk [vmem:[%s3696_s16 + $0x62] sm:$0x3] %vm3037_vm0, %v1828_v63  ;;  %v1844_v23 = vrot.slane %v331_v15, %v3667_v7  ;;  %v335_v24 = vcombine.high %v331_v15, %v331_v15  ;;  %v1860_v25 = vrot.slane %v373_v16, %v3667_v7  ;;  %v3968_v15 = vld [vmem:[%s3664_s12 + $0x38] sm:$0xff] }
  0x28   : > { %3072 = vst.msk [vmem:[%s3696_s16 + $0x44] sm:$0x3] %vm3037_vm0, %v1832_v0  ;;  %3088 = vst.msk [vmem:[%s3696_s16 + $0x64] sm:$0x3] %vm3037_vm0, %v1832_v0  ;;  %v383_v26 = vcombine.high %v373_v16, %v373_v16  ;;  %v366_v27 = vrot.slane %v350_v17, %v3659_v5  ;;  %v352_v28 = vcombine.high %v350_v17, %v350_v17 }
  0x29   : > { %3053 = vst.msk [vmem:[%s3696_s16 + $0x1e] sm:$0x3] %vm3037_vm0, %v1820_v3  ;;  %3069 = vst.msk [vmem:[%s3696_s16 + $0x3e] sm:$0x3] %vm3037_vm0, %v1820_v3  ;;  %v408_v29 = vrot.slane %v392_v19, %v3659_v5  ;;  %v400_v30 = vcombine.high %v392_v19, %v392_v19  ;;  %v1852_v31 = vrot.slane %v335_v24, %v3667_v7 }
  0x2a   : > { %3078 = vst.msk [vmem:[%s3696_s16 + $0x50] sm:$0x3] %vm3037_vm0, %v1856_v6  ;;  %3094 = vst.msk [vmem:[%s3696_s16 + $0x70] sm:$0x3] %vm3037_vm0, %v1856_v6  ;;  %v1868_v32 = vrot.slane %v383_v26, %v3667_v7  ;;  %v399_v33 = vrot.slane %v385_v18, %v3659_v5  ;;  %v457_v34 = vrot.slane %v3849_v22, %v3659_v5 }
  0x2b   : > { %3073 = vst.msk [vmem:[%s3696_s16 + $0x46] sm:$0x3] %vm3037_vm0, %v1836_v10  ;;  %3089 = vst.msk [vmem:[%s3696_s16 + $0x66] sm:$0x3] %vm3037_vm0, %v1836_v10  ;;  %v1872_v35 = vrot.slane %v366_v27, %v3667_v7  ;;  %v380_v36 = vrot.slane %v352_v28, %v3659_v5  ;;  %v382_v37 = vcombine.high %v366_v27, %v366_v27 }
  0x2c   : > { %3074 = vst.msk [vmem:[%s3696_s16 + $0x48] sm:$0x3] %vm3037_vm0, %v1840_v11  ;;  %3090 = vst.msk [vmem:[%s3696_s16 + $0x68] sm:$0x3] %vm3037_vm0, %v1840_v11  ;;  %v1888_v38 = vrot.slane %v408_v29, %v3667_v7  ;;  %v422_v39 = vrot.slane %v400_v30, %v3659_v5  ;;  %v430_v40 = vcombine.high %v408_v29, %v408_v29 }
  0x2d   : > { %3076 = vst.msk [vmem:[%s3696_s16 + $0x4c] sm:$0x3] %vm3037_vm0, %v1848_v21  ;;  %3092 = vst.msk [vmem:[%s3696_s16 + $0x6c] sm:$0x3] %vm3037_vm0, %v1848_v21  ;;  %v415_v41 = vrot.slane %v399_v33, %v3659_v5  ;;  %v401_v42 = vcombine.high %v399_v33, %v399_v33  ;;  %v1876_v43 = vrot.slane %v380_v36, %v3667_v7 }
  0x2e   : > { %3080 = vst.msk [vmem:[%s3696_s16 + $0x54] sm:$0x3] %vm3037_vm0, %v1864_v14  ;;  %3096 = vst.msk [vmem:[%s3696_s16 + $0x74] sm:$0x3] %vm3037_vm0, %v1864_v14  ;;  %v1880_v44 = vrot.slane %v382_v37, %v3667_v7  ;;  %v384_v45 = vcombine.high %v380_v36, %v380_v36  ;;  %v1920_v46 = vrot.slane %v457_v34, %v3667_v7 }
  0x2f   : > { %3075 = vst.msk [vmem:[%s3696_s16 + $0x4a] sm:$0x3] %vm3037_vm0, %v1844_v23  ;;  %3091 = vst.msk [vmem:[%s3696_s16 + $0x6a] sm:$0x3] %vm3037_vm0, %v1844_v23  ;;  %v1892_v47 = vrot.slane %v422_v39, %v3667_v7  ;;  %v1896_v48 = vrot.slane %v430_v40, %v3667_v7  ;;  %v432_v49 = vcombine.high %v422_v39, %v422_v39  ;;  %v4025_v40 = vld [vmem:[%s3664_s12 + $0x48] sm:$0xff] }
  0x30   : > { %3079 = vst.msk [vmem:[%s3696_s16 + $0x52] sm:$0x3] %vm3037_vm0, %v1860_v25  ;;  %3095 = vst.msk [vmem:[%s3696_s16 + $0x72] sm:$0x3] %vm3037_vm0, %v1860_v25  ;;  %v1904_v50 = vrot.slane %v415_v41, %v3667_v7  ;;  %v1884_v51 = vrot.slane %v384_v45, %v3667_v7  ;;  %v429_v52 = vrot.slane %v401_v42, %v3659_v5 }
  0x31   : > { %3077 = vst.msk [vmem:[%s3696_s16 + $0x4e] sm:$0x3] %vm3037_vm0, %v1852_v31  ;;  %3093 = vst.msk [vmem:[%s3696_s16 + $0x6e] sm:$0x3] %vm3037_vm0, %v1852_v31  ;;  %v431_v53 = vcombine.high %v415_v41, %v415_v41  ;;  %v449_v54 = vcombine.high %v3849_v22, %v3849_v22  ;;  %v1900_v56 = vrot.slane %v432_v49, %v3667_v7 }
  0x32   : > { %3081 = vst.msk [vmem:[%s3696_s16 + $0x56] sm:$0x3] %vm3037_vm0, %v1868_v32  ;;  %3097 = vst.msk [vmem:[%s3696_s16 + $0x76] sm:$0x3] %vm3037_vm0, %v1868_v32  ;;  %v479_v57 = vcombine.high %v457_v34, %v457_v34  ;;  %v434_v58 = vcombine.high %v3835_v20, %v3835_v20  ;;  %v490_v59 = vrot.slane %v131_v55, %v3659_v5 }
  0x33   : > { %3082 = vst.msk [vmem:[%s3696_s16 + $0x58] sm:$0x3] %vm3037_vm0, %v1872_v35  ;;  %3098 = vst.msk [vmem:[%s3696_s16 + $0x78] sm:$0x3] %vm3037_vm0, %v1872_v35  ;;  %v1908_v60 = vrot.slane %v429_v52, %v3667_v7  ;;  %v1912_v61 = vrot.slane %v431_v53, %v3667_v7  ;;  %v433_v62 = vcombine.high %v429_v52, %v429_v52  ;;  %v133_v35 = vld [vmem:[%s3664_s12 + $0x40] sm:$0xff] }
  0x34   : > { %3102 = vst.msk [vmem:[%s3696_s16 + $0x80] sm:$0x3] %vm3037_vm0, %v1888_v38  ;;  %3118 = vst.msk [vmem:[%s3696_s16 + $0xa0] sm:$0x3] %vm3037_vm0, %v1888_v38  ;;  %v471_v63 = vrot.slane %v449_v54, %v3659_v5  ;;  %v1928_v0 = vrot.slane %v479_v57, %v3667_v7  ;;  %v448_v1 = vrot.slane %v434_v58, %v3659_v5 }
  0x35   : > { %3083 = vst.msk [vmem:[%s3696_s16 + $0x5a] sm:$0x3] %vm3037_vm0, %v1876_v43  ;;  %3099 = vst.msk [vmem:[%s3696_s16 + $0x7a] sm:$0x3] %vm3037_vm0, %v1876_v43  ;;  %v506_v2 = vrot.slane %v490_v59, %v3659_v5  ;;  %v498_v3 = vcombine.high %v490_v59, %v490_v59  ;;  %v1916_v4 = vrot.slane %v433_v62, %v3667_v7 }
  0x36   : > { %3084 = vst.msk [vmem:[%s3696_s16 + $0x5c] sm:$0x3] %vm3037_vm0, %v1880_v44  ;;  %3100 = vst.msk [vmem:[%s3696_s16 + $0x7c] sm:$0x3] %vm3037_vm0, %v1880_v44  ;;  %v1924_v6 = vrot.slane %v471_v63, %v3667_v7  ;;  %v481_v8 = vcombine.high %v471_v63, %v471_v63  ;;  %v483_v9 = vcombine.high %v131_v55, %v131_v55 }
  0x37   : > { %3110 = vst.msk [vmem:[%s3696_s16 + $0x90] sm:$0x3] %vm3037_vm0, %v1920_v46  ;;  %3126 = vst.msk [vmem:[%s3696_s16 + $0xb0] sm:$0x3] %vm3037_vm0, %v1920_v46  ;;  %v464_v10 = vrot.slane %v448_v1, %v3659_v5  ;;  %v450_v11 = vcombine.high %v448_v1, %v448_v1  ;;  %v1952_v12 = vrot.slane %v506_v2, %v3667_v7 }
  0x38   : > { %3103 = vst.msk [vmem:[%s3696_s16 + $0x82] sm:$0x3] %vm3037_vm0, %v1892_v47  ;;  %3119 = vst.msk [vmem:[%s3696_s16 + $0xa2] sm:$0x3] %vm3037_vm0, %v1892_v47  ;;  %v520_v13 = vrot.slane %v498_v3, %v3659_v5  ;;  %v1932_v16 = vrot.slane %v481_v8, %v3667_v7  ;;  %v528_v17 = vcombine.high %v506_v2, %v506_v2 }
  0x39   : > { %3104 = vst.msk [vmem:[%s3696_s16 + $0x84] sm:$0x3] %vm3037_vm0, %v1896_v48  ;;  %3120 = vst.msk [vmem:[%s3696_s16 + $0xa4] sm:$0x3] %vm3037_vm0, %v1896_v48  ;;  %v497_v19 = vrot.slane %v483_v9, %v3659_v5  ;;  %v539_v20 = vrot.slane %v3968_v15, %v3659_v5  ;;  %v1936_v21 = vrot.slane %v464_v10, %v3667_v7 }
  0x3a   : > { %3106 = vst.msk [vmem:[%s3696_s16 + $0x88] sm:$0x3] %vm3037_vm0, %v1904_v50  ;;  %3122 = vst.msk [vmem:[%s3696_s16 + $0xa8] sm:$0x3] %vm3037_vm0, %v1904_v50  ;;  %v478_v14 = vrot.slane %v450_v11, %v3659_v5  ;;  %v480_v18 = vcombine.high %v464_v10, %v464_v10  ;;  %v1956_v22 = vrot.slane %v520_v13, %v3667_v7 }
  0x3b   : > { %3085 = vst.msk [vmem:[%s3696_s16 + $0x5e] sm:$0x3] %vm3037_vm0, %v1884_v51  ;;  %3101 = vst.msk [vmem:[%s3696_s16 + $0x7e] sm:$0x3] %vm3037_vm0, %v1884_v51  ;;  %v1960_v23 = vrot.slane %v528_v17, %v3667_v7  ;;  %v530_v24 = vcombine.high %v520_v13, %v520_v13  ;;  %v513_v25 = vrot.slane %v497_v19, %v3659_v5 }
  0x3c   : > { %3105 = vst.msk [vmem:[%s3696_s16 + $0x86] sm:$0x3] %vm3037_vm0, %v1900_v56  ;;  %3121 = vst.msk [vmem:[%s3696_s16 + $0xa6] sm:$0x3] %vm3037_vm0, %v1900_v56  ;;  %v499_v26 = vcombine.high %v497_v19, %v497_v19  ;;  %v1940_v27 = vrot.slane %v478_v14, %v3667_v7  ;;  %v1944_v28 = vrot.slane %v480_v18, %v3667_v7 }
  0x3d   : > { %3107 = vst.msk [vmem:[%s3696_s16 + $0x8a] sm:$0x3] %vm3037_vm0, %v1908_v60  ;;  %3123 = vst.msk [vmem:[%s3696_s16 + $0xaa] sm:$0x3] %vm3037_vm0, %v1908_v60  ;;  %v482_v29 = vcombine.high %v478_v14, %v478_v14  ;;  %v555_v30 = vrot.slane %v539_v20, %v3659_v5  ;;  %v1964_v31 = vrot.slane %v530_v24, %v3667_v7 }
  0x3e   : > { %3108 = vst.msk [vmem:[%s3696_s16 + $0x8c] sm:$0x3] %vm3037_vm0, %v1912_v61  ;;  %3124 = vst.msk [vmem:[%s3696_s16 + $0xac] sm:$0x3] %vm3037_vm0, %v1912_v61  ;;  %v1968_v32 = vrot.slane %v513_v25, %v3667_v7  ;;  %v527_v33 = vrot.slane %v499_v26, %v3659_v5  ;;  %v529_v34 = vcombine.high %v513_v25, %v513_v25 }
  0x3f   : > { %3112 = vst.msk [vmem:[%s3696_s16 + $0x94] sm:$0x3] %vm3037_vm0, %v1928_v0  ;;  %3128 = vst.msk [vmem:[%s3696_s16 + $0xb4] sm:$0x3] %vm3037_vm0, %v1928_v0  ;;  %v1948_v36 = vrot.slane %v482_v29, %v3667_v7  ;;  %v1984_v37 = vrot.slane %v555_v30, %v3667_v7  ;;  %v547_v38 = vcombine.high %v539_v20, %v539_v20 }
  0x40   : > { %3109 = vst.msk [vmem:[%s3696_s16 + $0x8e] sm:$0x3] %vm3037_vm0, %v1916_v4  ;;  %3125 = vst.msk [vmem:[%s3696_s16 + $0xae] sm:$0x3] %vm3037_vm0, %v1916_v4  ;;  %v577_v39 = vcombine.high %v555_v30, %v555_v30  ;;  %v1972_v41 = vrot.slane %v527_v33, %v3667_v7  ;;  %v1976_v42 = vrot.slane %v529_v34, %v3667_v7 }
  0x41   : > { %3111 = vst.msk [vmem:[%s3696_s16 + $0x92] sm:$0x3] %vm3037_vm0, %v1924_v6  ;;  %3127 = vst.msk [vmem:[%s3696_s16 + $0xb2] sm:$0x3] %vm3037_vm0, %v1924_v6  ;;  %v531_v43 = vcombine.high %v527_v33, %v527_v33  ;;  %v532_v44 = vcombine.high %v3968_v15, %v3968_v15  ;;  %v569_v45 = vrot.slane %v547_v38, %v3659_v5 }
  0x42   : > { %3134 = vst.msk [vmem:[%s3696_s16 + $0xc0] sm:$0x3] %vm3037_vm0, %v1952_v12  ;;  %3150 = vst.msk [vmem:[%s3696_s16 + $0xe0] sm:$0x3] %vm3037_vm0, %v1952_v12  ;;  %v1992_v46 = vrot.slane %v577_v39, %v3667_v7  ;;  %v588_v47 = vrot.slane %v133_v35, %v3659_v5  ;;  %v581_v48 = vcombine.high %v133_v35, %v133_v35 }
  0x43   : > { %3113 = vst.msk [vmem:[%s3696_s16 + $0x96] sm:$0x3] %vm3037_vm0, %v1932_v16  ;;  %3129 = vst.msk [vmem:[%s3696_s16 + $0xb6] sm:$0x3] %vm3037_vm0, %v1932_v16  ;;  %v1980_v49 = vrot.slane %v531_v43, %v3667_v7  ;;  %v546_v50 = vrot.slane %v532_v44, %v3659_v5  ;;  %v4062_v51 = vrot.slane %v4025_v40, %v3659_v5 }
  0x44   : > { %3114 = vst.msk [vmem:[%s3696_s16 + $0x98] sm:$0x3] %vm3037_vm0, %v1936_v21  ;;  %3130 = vst.msk [vmem:[%s3696_s16 + $0xb8] sm:$0x3] %vm3037_vm0, %v1936_v21  ;;  %v630_v52 = vcombine.high %v4025_v40, %v4025_v40  ;;  %v1988_v53 = vrot.slane %v569_v45, %v3667_v7  ;;  %v579_v54 = vcombine.high %v569_v45, %v569_v45 }
  0x45   : > { %3135 = vst.msk [vmem:[%s3696_s16 + $0xc2] sm:$0x3] %vm3037_vm0, %v1956_v22  ;;  %3151 = vst.msk [vmem:[%s3696_s16 + $0xe2] sm:$0x3] %vm3037_vm0, %v1956_v22  ;;  %v604_v55 = vrot.slane %v588_v47, %v3659_v5  ;;  %v596_v56 = vcombine.high %v588_v47, %v588_v47  ;;  %v562_v57 = vrot.slane %v546_v50, %v3659_v5 }
  0x46   : > { %3136 = vst.msk [vmem:[%s3696_s16 + $0xc4] sm:$0x3] %vm3037_vm0, %v1960_v23  ;;  %3152 = vst.msk [vmem:[%s3696_s16 + $0xe4] sm:$0x3] %vm3037_vm0, %v1960_v23  ;;  %v548_v58 = vcombine.high %v546_v50, %v546_v50  ;;  %v595_v59 = vrot.slane %v581_v48, %v3659_v5  ;;  %v653_v60 = vrot.slane %v4062_v51, %v3659_v5  ;;  %v135_v23 = vld [vmem:[%s3664_s12 + $0x50] sm:$0xff]  ;;  %v136_v48 = vld [vmem:[%s3664_s12 + $0x58] sm:$0xff] }
  0x47   : > { %3115 = vst.msk [vmem:[%s3696_s16 + $0x9a] sm:$0x3] %vm3037_vm0, %v1940_v27  ;;  %3131 = vst.msk [vmem:[%s3696_s16 + $0xba] sm:$0x3] %vm3037_vm0, %v1940_v27  ;;  %v1996_v61 = vrot.slane %v579_v54, %v3667_v7  ;;  %v2016_v62 = vrot.slane %v604_v55, %v3667_v7  ;;  %v618_v63 = vrot.slane %v596_v56, %v3659_v5 }
  0x48   : > { %3116 = vst.msk [vmem:[%s3696_s16 + $0x9c] sm:$0x3] %vm3037_vm0, %v1944_v28  ;;  %3132 = vst.msk [vmem:[%s3696_s16 + $0xbc] sm:$0x3] %vm3037_vm0, %v1944_v28  ;;  %v626_v0 = vcombine.high %v604_v55, %v604_v55  ;;  %v2000_v1 = vrot.slane %v562_v57, %v3667_v7  ;;  %v576_v2 = vrot.slane %v548_v58, %v3659_v5 }
  0x49   : > { %3137 = vst.msk [vmem:[%s3696_s16 + $0xc6] sm:$0x3] %vm3037_vm0, %v1964_v31  ;;  %3153 = vst.msk [vmem:[%s3696_s16 + $0xe6] sm:$0x3] %vm3037_vm0, %v1964_v31  ;;  %v578_v3 = vcombine.high %v562_v57, %v562_v57  ;;  %v611_v4 = vrot.slane %v595_v59, %v3659_v5  ;;  %v2020_v6 = vrot.slane %v618_v63, %v3667_v7 }
  0x4a   : > { %3138 = vst.msk [vmem:[%s3696_s16 + $0xc8] sm:$0x3] %vm3037_vm0, %v1968_v32  ;;  %3154 = vst.msk [vmem:[%s3696_s16 + $0xe8] sm:$0x3] %vm3037_vm0, %v1968_v32  ;;  %v2024_v8 = vrot.slane %v626_v0, %v3667_v7  ;;  %v628_v9 = vcombine.high %v618_v63, %v618_v63  ;;  %v597_v10 = vcombine.high %v595_v59, %v595_v59 }
  0x4b   : > { %3117 = vst.msk [vmem:[%s3696_s16 + $0x9e] sm:$0x3] %vm3037_vm0, %v1948_v36  ;;  %3133 = vst.msk [vmem:[%s3696_s16 + $0xbe] sm:$0x3] %vm3037_vm0, %v1948_v36  ;;  %v2004_v11 = vrot.slane %v576_v2, %v3667_v7  ;;  %v2008_v12 = vrot.slane %v578_v3, %v3667_v7  ;;  %v580_v13 = vcombine.high %v576_v2, %v576_v2 }
  0x4c   : > { %3142 = vst.msk [vmem:[%s3696_s16 + $0xd0] sm:$0x3] %vm3037_vm0, %v1984_v37  ;;  %3158 = vst.msk [vmem:[%s3696_s16 + $0xf0] sm:$0x3] %vm3037_vm0, %v1984_v37  ;;  %v2032_v15 = vrot.slane %v611_v4, %v3667_v7  ;;  %v2028_v16 = vrot.slane %v628_v9, %v3667_v7  ;;  %v625_v17 = vrot.slane %v597_v10, %v3659_v5 }
  0x4d   : > { %3139 = vst.msk [vmem:[%s3696_s16 + $0xca] sm:$0x3] %vm3037_vm0, %v1972_v41  ;;  %3155 = vst.msk [vmem:[%s3696_s16 + $0xea] sm:$0x3] %vm3037_vm0, %v1972_v41  ;;  %v627_v19 = vcombine.high %v611_v4, %v611_v4  ;;  %v2048_v20 = vrot.slane %v653_v60, %v3667_v7  ;;  %v2012_v21 = vrot.slane %v580_v13, %v3667_v7 }
  0x4e   : > { %3140 = vst.msk [vmem:[%s3696_s16 + $0xcc] sm:$0x3] %vm3037_vm0, %v1976_v42  ;;  %3156 = vst.msk [vmem:[%s3696_s16 + $0xec] sm:$0x3] %vm3037_vm0, %v1976_v42  ;;  %v645_v14 = vcombine.high %v4062_v51, %v4062_v51  ;;  %v675_v18 = vcombine.high %v653_v60, %v653_v60  ;;  %v644_v22 = vrot.slane %v630_v52, %v3659_v5 }
  0x4f   : > { %3144 = vst.msk [vmem:[%s3696_s16 + $0xd4] sm:$0x3] %vm3037_vm0, %v1992_v46  ;;  %3160 = vst.msk [vmem:[%s3696_s16 + $0xf4] sm:$0x3] %vm3037_vm0, %v1992_v46  ;;  %v2036_v24 = vrot.slane %v625_v17, %v3667_v7  ;;  %v2040_v25 = vrot.slane %v627_v19, %v3667_v7  ;;  %v629_v26 = vcombine.high %v625_v17, %v625_v17 }
  0x50   : > { %3141 = vst.msk [vmem:[%s3696_s16 + $0xce] sm:$0x3] %vm3037_vm0, %v1980_v49  ;;  %3157 = vst.msk [vmem:[%s3696_s16 + $0xee] sm:$0x3] %vm3037_vm0, %v1980_v49  ;;  %v686_v27 = vrot.slane %v135_v23, %v3659_v5  ;;  %v667_v28 = vrot.slane %v645_v14, %v3659_v5  ;;  %v2056_v29 = vrot.slane %v675_v18, %v3667_v7  ;;  %v4189_v49 = vld [vmem:[%s3664_s12 + $0x60] sm:$0xff] }
  0x51   : > { %3143 = vst.msk [vmem:[%s3696_s16 + $0xd2] sm:$0x3] %vm3037_vm0, %v1988_v53  ;;  %3159 = vst.msk [vmem:[%s3696_s16 + $0xf2] sm:$0x3] %vm3037_vm0, %v1988_v53  ;;  %v660_v30 = vrot.slane %v644_v22, %v3659_v5  ;;  %v646_v31 = vcombine.high %v644_v22, %v644_v22  ;;  %v2044_v32 = vrot.slane %v629_v26, %v3667_v7 }
  0x52   : > { %3145 = vst.msk [vmem:[%s3696_s16 + $0xd6] sm:$0x3] %vm3037_vm0, %v1996_v61  ;;  %3161 = vst.msk [vmem:[%s3696_s16 + $0xf6] sm:$0x3] %vm3037_vm0, %v1996_v61  ;;  %v702_v33 = vrot.slane %v686_v27, %v3659_v5  ;;  %v694_v34 = vcombine.high %v686_v27, %v686_v27  ;;  %v679_v35 = vcombine.high %v135_v23, %v135_v23 }
  0x53   : > { %3166 = vst.msk [vmem:[%s3696_s16 + $0x100] sm:$0x3] %vm3037_vm0, %v2016_v62  ;;  %3182 = vst.msk [vmem:[%s3696_s16 + $0x120] sm:$0x3] %vm3037_vm0, %v2016_v62  ;;  %v2052_v36 = vrot.slane %v667_v28, %v3667_v7  ;;  %v677_v37 = vcombine.high %v667_v28, %v667_v28  ;;  %v2064_v38 = vrot.slane %v660_v30, %v3667_v7 }
  0x54   : > { %3146 = vst.msk [vmem:[%s3696_s16 + $0xd8] sm:$0x3] %vm3037_vm0, %v2000_v1  ;;  %3162 = vst.msk [vmem:[%s3696_s16 + $0xf8] sm:$0x3] %vm3037_vm0, %v2000_v1  ;;  %v674_v39 = vrot.slane %v646_v31, %v3659_v5  ;;  %v676_v40 = vcombine.high %v660_v30, %v660_v30  ;;  %v2080_v41 = vrot.slane %v702_v33, %v3667_v7 }
  0x55   : > { %3167 = vst.msk [vmem:[%s3696_s16 + $0x102] sm:$0x3] %vm3037_vm0, %v2020_v6  ;;  %3183 = vst.msk [vmem:[%s3696_s16 + $0x122] sm:$0x3] %vm3037_vm0, %v2020_v6  ;;  %v716_v42 = vrot.slane %v694_v34, %v3659_v5  ;;  %v724_v43 = vcombine.high %v702_v33, %v702_v33  ;;  %v2060_v44 = vrot.slane %v677_v37, %v3667_v7 }
  0x56   : > { %3168 = vst.msk [vmem:[%s3696_s16 + $0x104] sm:$0x3] %vm3037_vm0, %v2024_v8  ;;  %3184 = vst.msk [vmem:[%s3696_s16 + $0x124] sm:$0x3] %vm3037_vm0, %v2024_v8  ;;  %v2068_v45 = vrot.slane %v674_v39, %v3667_v7  ;;  %v678_v46 = vcombine.high %v674_v39, %v674_v39  ;;  %v693_v47 = vrot.slane %v679_v35, %v3659_v5 }
  0x57   : > { %3147 = vst.msk [vmem:[%s3696_s16 + $0xda] sm:$0x3] %vm3037_vm0, %v2004_v11  ;;  %3163 = vst.msk [vmem:[%s3696_s16 + $0xfa] sm:$0x3] %vm3037_vm0, %v2004_v11  ;;  %v2072_v50 = vrot.slane %v676_v40, %v3667_v7  ;;  %v2084_v51 = vrot.slane %v716_v42, %v3667_v7  ;;  %v2088_v52 = vrot.slane %v724_v43, %v3667_v7 }
  0x58   : > { %3148 = vst.msk [vmem:[%s3696_s16 + $0xdc] sm:$0x3] %vm3037_vm0, %v2008_v12  ;;  %3164 = vst.msk [vmem:[%s3696_s16 + $0xfc] sm:$0x3] %vm3037_vm0, %v2008_v12  ;;  %v726_v53 = vcombine.high %v716_v42, %v716_v42  ;;  %v2076_v54 = vrot.slane %v678_v46, %v3667_v7  ;;  %v709_v55 = vrot.slane %v693_v47, %v3659_v5 }
  0x59   : > { %3170 = vst.msk [vmem:[%s3696_s16 + $0x108] sm:$0x3] %vm3037_vm0, %v2032_v15  ;;  %3186 = vst.msk [vmem:[%s3696_s16 + $0x128] sm:$0x3] %vm3037_vm0, %v2032_v15  ;;  %v695_v56 = vcombine.high %v693_v47, %v693_v47  ;;  %v735_v57 = vrot.slane %v136_v48, %v3659_v5  ;;  %v728_v59 = vcombine.high %v136_v48, %v136_v48 }
  0x5a   : > { %3169 = vst.msk [vmem:[%s3696_s16 + $0x106] sm:$0x3] %vm3037_vm0, %v2028_v16  ;;  %3185 = vst.msk [vmem:[%s3696_s16 + $0x126] sm:$0x3] %vm3037_vm0, %v2028_v16  ;;  %v2092_v58 = vrot.slane %v726_v53, %v3667_v7  ;;  %v784_v60 = vrot.slane %v4189_v49, %v3659_v5  ;;  %v777_v61 = vcombine.high %v4189_v49, %v4189_v49 }
  0x5b   : > { %3174 = vst.msk [vmem:[%s3696_s16 + $0x110] sm:$0x3] %vm3037_vm0, %v2048_v20  ;;  %3190 = vst.msk [vmem:[%s3696_s16 + $0x130] sm:$0x3] %vm3037_vm0, %v2048_v20  ;;  %v2096_v62 = vrot.slane %v709_v55, %v3667_v7  ;;  %v723_v63 = vrot.slane %v695_v56, %v3659_v5  ;;  %v725_v0 = vcombine.high %v709_v55, %v709_v55 }
  0x5c   : > { %3149 = vst.msk [vmem:[%s3696_s16 + $0xde] sm:$0x3] %vm3037_vm0, %v2012_v21  ;;  %3165 = vst.msk [vmem:[%s3696_s16 + $0xfe] sm:$0x3] %vm3037_vm0, %v2012_v21  ;;  %v751_v1 = vrot.slane %v735_v57, %v3659_v5  ;;  %v743_v2 = vcombine.high %v735_v57, %v735_v57  ;;  %v742_v3 = vrot.slane %v728_v59, %v3659_v5 }
  0x5d   : > { %3171 = vst.msk [vmem:[%s3696_s16 + $0x10a] sm:$0x3] %vm3037_vm0, %v2036_v24  ;;  %3187 = vst.msk [vmem:[%s3696_s16 + $0x12a] sm:$0x3] %vm3037_vm0, %v2036_v24  ;;  %v800_v4 = vrot.slane %v784_v60, %v3659_v5  ;;  %v792_v6 = vcombine.high %v784_v60, %v784_v60  ;;  %v2100_v8 = vrot.slane %v723_v63, %v3667_v7  ;;  %v138_v24 = vld [vmem:[%s3664_s12 + $0x68] sm:$0xff] }
  0x5e   : > { %3172 = vst.msk [vmem:[%s3696_s16 + $0x10c] sm:$0x3] %vm3037_vm0, %v2040_v25  ;;  %3188 = vst.msk [vmem:[%s3696_s16 + $0x12c] sm:$0x3] %vm3037_vm0, %v2040_v25  ;;  %v2104_v9 = vrot.slane %v725_v0, %v3667_v7  ;;  %v727_v10 = vcombine.high %v723_v63, %v723_v63  ;;  %v2112_v11 = vrot.slane %v751_v1, %v3667_v7 }
  0x5f   : > { %3176 = vst.msk [vmem:[%s3696_s16 + $0x114] sm:$0x3] %vm3037_vm0, %v2056_v29  ;;  %3192 = vst.msk [vmem:[%s3696_s16 + $0x134] sm:$0x3] %vm3037_vm0, %v2056_v29  ;;  %v765_v12 = vrot.slane %v743_v2, %v3659_v5  ;;  %v773_v13 = vcombine.high %v751_v1, %v751_v1  ;;  %v758_v15 = vrot.slane %v742_v3, %v3659_v5  ;;  %v140_v2 = vld [vmem:[%s3664_s12 + $0x78] sm:$0xff] }
  0x60   : > { %3173 = vst.msk [vmem:[%s3696_s16 + $0x10e] sm:$0x3] %vm3037_vm0, %v2044_v32  ;;  %3189 = vst.msk [vmem:[%s3696_s16 + $0x12e] sm:$0x3] %vm3037_vm0, %v2044_v32  ;;  %v744_v16 = vcombine.high %v742_v3, %v742_v3  ;;  %v2108_v17 = vrot.slane %v727_v10, %v3667_v7  ;;  %v2144_v19 = vrot.slane %v800_v4, %v3667_v7 }
  0x61   : > { %3175 = vst.msk [vmem:[%s3696_s16 + $0x112] sm:$0x3] %vm3037_vm0, %v2052_v36  ;;  %3191 = vst.msk [vmem:[%s3696_s16 + $0x132] sm:$0x3] %vm3037_vm0, %v2052_v36  ;;  %v814_v20 = vrot.slane %v792_v6, %v3659_v5  ;;  %v822_v21 = vcombine.high %v800_v4, %v800_v4  ;;  %v2116_v14 = vrot.slane %v765_v12, %v3667_v7 }
  0x62   : > { %3178 = vst.msk [vmem:[%s3696_s16 + $0x118] sm:$0x3] %vm3037_vm0, %v2064_v38  ;;  %3194 = vst.msk [vmem:[%s3696_s16 + $0x138] sm:$0x3] %vm3037_vm0, %v2064_v38  ;;  %v2120_v18 = vrot.slane %v773_v13, %v3667_v7  ;;  %v775_v22 = vcombine.high %v765_v12, %v765_v12  ;;  %v2128_v23 = vrot.slane %v758_v15, %v3667_v7 }
  0x63   : > { %3198 = vst.msk [vmem:[%s3696_s16 + $0x140] sm:$0x3] %vm3037_vm0, %v2080_v41  ;;  %3214 = vst.msk [vmem:[%s3696_s16 + $0x160] sm:$0x3] %vm3037_vm0, %v2080_v41  ;;  %v772_v25 = vrot.slane %v744_v16, %v3659_v5  ;;  %v774_v26 = vcombine.high %v758_v15, %v758_v15  ;;  %v2148_v27 = vrot.slane %v814_v20, %v3667_v7  ;;  %v4311_v41 = vld [vmem:[%s3664_s12 + $0x70] sm:$0xff] }
  0x64   : > { %3177 = vst.msk [vmem:[%s3696_s16 + $0x116] sm:$0x3] %vm3037_vm0, %v2060_v44  ;;  %3193 = vst.msk [vmem:[%s3696_s16 + $0x136] sm:$0x3] %vm3037_vm0, %v2060_v44  ;;  %v2152_v28 = vrot.slane %v822_v21, %v3667_v7  ;;  %v2124_v29 = vrot.slane %v775_v22, %v3667_v7  ;;  %v824_v30 = vcombine.high %v814_v20, %v814_v20 }
  0x65   : > { %3179 = vst.msk [vmem:[%s3696_s16 + $0x11a] sm:$0x3] %vm3037_vm0, %v2068_v45  ;;  %3195 = vst.msk [vmem:[%s3696_s16 + $0x13a] sm:$0x3] %vm3037_vm0, %v2068_v45  ;;  %v791_v31 = vrot.slane %v777_v61, %v3659_v5  ;;  %v833_v32 = vrot.slane %v138_v24, %v3659_v5  ;;  %v2132_v33 = vrot.slane %v772_v25, %v3667_v7 }
  0x66   : > { %3180 = vst.msk [vmem:[%s3696_s16 + $0x11c] sm:$0x3] %vm3037_vm0, %v2072_v50  ;;  %3196 = vst.msk [vmem:[%s3696_s16 + $0x13c] sm:$0x3] %vm3037_vm0, %v2072_v50  ;;  %v2136_v34 = vrot.slane %v774_v26, %v3667_v7  ;;  %v776_v35 = vcombine.high %v772_v25, %v772_v25  ;;  %v826_v36 = vcombine.high %v138_v24, %v138_v24 }
  0x67   : > { %3199 = vst.msk [vmem:[%s3696_s16 + $0x142] sm:$0x3] %vm3037_vm0, %v2084_v51  ;;  %3215 = vst.msk [vmem:[%s3696_s16 + $0x162] sm:$0x3] %vm3037_vm0, %v2084_v51  ;;  %v2156_v37 = vrot.slane %v824_v30, %v3667_v7  ;;  %v807_v38 = vrot.slane %v791_v31, %v3659_v5  ;;  %v793_v39 = vcombine.high %v791_v31, %v791_v31 }
  0x68   : > { %3200 = vst.msk [vmem:[%s3696_s16 + $0x144] sm:$0x3] %vm3037_vm0, %v2088_v52  ;;  %3216 = vst.msk [vmem:[%s3696_s16 + $0x164] sm:$0x3] %vm3037_vm0, %v2088_v52  ;;  %v849_v40 = vrot.slane %v833_v32, %v3659_v5  ;;  %v2140_v42 = vrot.slane %v776_v35, %v3667_v7  ;;  %v841_v43 = vcombine.high %v833_v32, %v833_v32 }
  0x69   : > { %3181 = vst.msk [vmem:[%s3696_s16 + $0x11e] sm:$0x3] %vm3037_vm0, %v2076_v54  ;;  %3197 = vst.msk [vmem:[%s3696_s16 + $0x13e] sm:$0x3] %vm3037_vm0, %v2076_v54  ;;  %v840_v44 = vrot.slane %v826_v36, %v3659_v5  ;;  %v882_v45 = vrot.slane %v4311_v41, %v3659_v5  ;;  %v2160_v46 = vrot.slane %v807_v38, %v3667_v7 }
  0x6a   : > { %3201 = vst.msk [vmem:[%s3696_s16 + $0x146] sm:$0x3] %vm3037_vm0, %v2092_v58  ;;  %3217 = vst.msk [vmem:[%s3696_s16 + $0x166] sm:$0x3] %vm3037_vm0, %v2092_v58  ;;  %v821_v47 = vrot.slane %v793_v39, %v3659_v5  ;;  %v823_v48 = vcombine.high %v807_v38, %v807_v38  ;;  %v2176_v49 = vrot.slane %v849_v40, %v3667_v7 }
  0x6b   : > { %3202 = vst.msk [vmem:[%s3696_s16 + $0x148] sm:$0x3] %vm3037_vm0, %v2096_v62  ;;  %3218 = vst.msk [vmem:[%s3696_s16 + $0x168] sm:$0x3] %vm3037_vm0, %v2096_v62  ;;  %v863_v50 = vrot.slane %v841_v43, %v3659_v5  ;;  %v871_v51 = vcombine.high %v849_v40, %v849_v40  ;;  %v856_v52 = vrot.slane %v840_v44, %v3659_v5 }
  0x6c   : > { %3203 = vst.msk [vmem:[%s3696_s16 + $0x14a] sm:$0x3] %vm3037_vm0, %v2100_v8  ;;  %3219 = vst.msk [vmem:[%s3696_s16 + $0x16a] sm:$0x3] %vm3037_vm0, %v2100_v8  ;;  %v842_v53 = vcombine.high %v840_v44, %v840_v44  ;;  %v2164_v54 = vrot.slane %v821_v47, %v3667_v7  ;;  %v2168_v55 = vrot.slane %v823_v48, %v3667_v7 }
  0x6d   : > { %3204 = vst.msk [vmem:[%s3696_s16 + $0x14c] sm:$0x3] %vm3037_vm0, %v2104_v9  ;;  %3220 = vst.msk [vmem:[%s3696_s16 + $0x16c] sm:$0x3] %vm3037_vm0, %v2104_v9  ;;  %v825_v56 = vcombine.high %v821_v47, %v821_v47  ;;  %v898_v57 = vrot.slane %v882_v45, %v3659_v5  ;;  %v2180_v58 = vrot.slane %v863_v50, %v3667_v7 }
  0x6e   : > { %3206 = vst.msk [vmem:[%s3696_s16 + $0x150] sm:$0x3] %vm3037_vm0, %v2112_v11  ;;  %3222 = vst.msk [vmem:[%s3696_s16 + $0x170] sm:$0x3] %vm3037_vm0, %v2112_v11  ;;  %v2184_v59 = vrot.slane %v871_v51, %v3667_v7  ;;  %v873_v60 = vcombine.high %v863_v50, %v863_v50  ;;  %v2192_v61 = vrot.slane %v856_v52, %v3667_v7  ;;  %v142_v50 = vld [vmem:[%s3664_s12 + $0x88] sm:$0xff] }
  0x6f   : > { %3205 = vst.msk [vmem:[%s3696_s16 + $0x14e] sm:$0x3] %vm3037_vm0, %v2108_v17  ;;  %3221 = vst.msk [vmem:[%s3696_s16 + $0x16e] sm:$0x3] %vm3037_vm0, %v2108_v17  ;;  %v2172_v62 = vrot.slane %v825_v56, %v3667_v7  ;;  %v870_v63 = vrot.slane %v842_v53, %v3659_v5  ;;  %v872_v0 = vcombine.high %v856_v52, %v856_v52 }
  0x70   : > { %3230 = vst.msk [vmem:[%s3696_s16 + $0x180] sm:$0x3] %vm3037_vm0, %v2144_v19  ;;  %3246 = vst.msk [vmem:[%s3696_s16 + $0x1a0] sm:$0x3] %vm3037_vm0, %v2144_v19  ;;  %v2208_v1 = vrot.slane %v898_v57, %v3667_v7  ;;  %v2188_v3 = vrot.slane %v873_v60, %v3667_v7  ;;  %v890_v4 = vcombine.high %v882_v45, %v882_v45  ;;  %v4398_v19 = vld [vmem:[%s3664_s12 + $0x80] sm:$0xff] }
  0x71   : > { %3207 = vst.msk [vmem:[%s3696_s16 + $0x152] sm:$0x3] %vm3037_vm0, %v2116_v14  ;;  %3223 = vst.msk [vmem:[%s3696_s16 + $0x172] sm:$0x3] %vm3037_vm0, %v2116_v14  ;;  %v920_v6 = vcombine.high %v898_v57, %v898_v57  ;;  %v875_v8 = vcombine.high %v4311_v41, %v4311_v41  ;;  %v2196_v9 = vrot.slane %v870_v63, %v3667_v7 }
  0x72   : > { %3208 = vst.msk [vmem:[%s3696_s16 + $0x154] sm:$0x3] %vm3037_vm0, %v2120_v18  ;;  %3224 = vst.msk [vmem:[%s3696_s16 + $0x174] sm:$0x3] %vm3037_vm0, %v2120_v18  ;;  %v2200_v10 = vrot.slane %v872_v0, %v3667_v7  ;;  %v874_v11 = vcombine.high %v870_v63, %v870_v63  ;;  %v931_v12 = vrot.slane %v140_v2, %v3659_v5 }
  0x73   : > { %3210 = vst.msk [vmem:[%s3696_s16 + $0x158] sm:$0x3] %vm3037_vm0, %v2128_v23  ;;  %3226 = vst.msk [vmem:[%s3696_s16 + $0x178] sm:$0x3] %vm3037_vm0, %v2128_v23  ;;  %v912_v13 = vrot.slane %v890_v4, %v3659_v5  ;;  %v2216_v15 = vrot.slane %v920_v6, %v3667_v7  ;;  %v889_v16 = vrot.slane %v875_v8, %v3659_v5 }
  0x74   : > { %3231 = vst.msk [vmem:[%s3696_s16 + $0x182] sm:$0x3] %vm3037_vm0, %v2148_v27  ;;  %3247 = vst.msk [vmem:[%s3696_s16 + $0x1a2] sm:$0x3] %vm3037_vm0, %v2148_v27  ;;  %v924_v17 = vcombine.high %v140_v2, %v140_v2  ;;  %v2204_v20 = vrot.slane %v874_v11, %v3667_v7  ;;  %v947_v21 = vrot.slane %v931_v12, %v3659_v5 }
  0x75   : > { %3232 = vst.msk [vmem:[%s3696_s16 + $0x184] sm:$0x3] %vm3037_vm0, %v2152_v28  ;;  %3248 = vst.msk [vmem:[%s3696_s16 + $0x1a4] sm:$0x3] %vm3037_vm0, %v2152_v28  ;;  %v939_v14 = vcombine.high %v931_v12, %v931_v12  ;;  %v4412_v18 = vrot.slane %v4398_v19, %v3659_v5  ;;  %v2212_v22 = vrot.slane %v912_v13, %v3667_v7 }
  0x76   : > { %3209 = vst.msk [vmem:[%s3696_s16 + $0x156] sm:$0x3] %vm3037_vm0, %v2124_v29  ;;  %3225 = vst.msk [vmem:[%s3696_s16 + $0x176] sm:$0x3] %vm3037_vm0, %v2124_v29  ;;  %v922_v23 = vcombine.high %v912_v13, %v912_v13  ;;  %v905_v24 = vrot.slane %v889_v16, %v3659_v5  ;;  %v891_v25 = vcombine.high %v889_v16, %v889_v16  ;;  %v143_v13 = vld [vmem:[%s3664_s12 + $0x90] sm:$0xff] }
  0x77   : > { %3211 = vst.msk [vmem:[%s3696_s16 + $0x15a] sm:$0x3] %vm3037_vm0, %v2132_v33  ;;  %3227 = vst.msk [vmem:[%s3696_s16 + $0x17a] sm:$0x3] %vm3037_vm0, %v2132_v33  ;;  %v2240_v26 = vrot.slane %v947_v21, %v3667_v7  ;;  %v961_v27 = vrot.slane %v939_v14, %v3659_v5  ;;  %v969_v28 = vcombine.high %v947_v21, %v947_v21 }
  0x78   : > { %3212 = vst.msk [vmem:[%s3696_s16 + $0x15c] sm:$0x3] %vm3037_vm0, %v2136_v34  ;;  %3228 = vst.msk [vmem:[%s3696_s16 + $0x17c] sm:$0x3] %vm3037_vm0, %v2136_v34  ;;  %v938_v29 = vrot.slane %v924_v17, %v3659_v5  ;;  %v2220_v30 = vrot.slane %v922_v23, %v3667_v7  ;;  %v2224_v31 = vrot.slane %v905_v24, %v3667_v7 }
  0x79   : > { %3233 = vst.msk [vmem:[%s3696_s16 + $0x186] sm:$0x3] %vm3037_vm0, %v2156_v37  ;;  %3249 = vst.msk [vmem:[%s3696_s16 + $0x1a6] sm:$0x3] %vm3037_vm0, %v2156_v37  ;;  %v919_v32 = vrot.slane %v891_v25, %v3659_v5  ;;  %v921_v33 = vcombine.high %v905_v24, %v905_v24  ;;  %v2244_v34 = vrot.slane %v961_v27, %v3667_v7 }
  0x7a   : > { %3213 = vst.msk [vmem:[%s3696_s16 + $0x15e] sm:$0x3] %vm3037_vm0, %v2140_v42  ;;  %3229 = vst.msk [vmem:[%s3696_s16 + $0x17e] sm:$0x3] %vm3037_vm0, %v2140_v42  ;;  %v2248_v35 = vrot.slane %v969_v28, %v3667_v7  ;;  %v971_v36 = vcombine.high %v961_v27, %v961_v27  ;;  %v954_v37 = vrot.slane %v938_v29, %v3659_v5 }
  0x7b   : > { %3234 = vst.msk [vmem:[%s3696_s16 + $0x188] sm:$0x3] %vm3037_vm0, %v2160_v46  ;;  %3250 = vst.msk [vmem:[%s3696_s16 + $0x1a8] sm:$0x3] %vm3037_vm0, %v2160_v46  ;;  %v2228_v38 = vrot.slane %v919_v32, %v3667_v7  ;;  %v2232_v39 = vrot.slane %v921_v33, %v3667_v7  ;;  %v923_v40 = vcombine.high %v919_v32, %v919_v32 }
  0x7c   : > { %3238 = vst.msk [vmem:[%s3696_s16 + $0x190] sm:$0x3] %vm3037_vm0, %v2176_v49  ;;  %3254 = vst.msk [vmem:[%s3696_s16 + $0x1b0] sm:$0x3] %vm3037_vm0, %v2176_v49  ;;  %v940_v41 = vcombine.high %v938_v29, %v938_v29  ;;  %v2252_v42 = vrot.slane %v971_v36, %v3667_v7  ;;  %v2256_v43 = vrot.slane %v954_v37, %v3667_v7 }
  0x7d   : > { %3235 = vst.msk [vmem:[%s3696_s16 + $0x18a] sm:$0x3] %vm3037_vm0, %v2164_v54  ;;  %3251 = vst.msk [vmem:[%s3696_s16 + $0x1aa] sm:$0x3] %vm3037_vm0, %v2164_v54  ;;  %v970_v44 = vcombine.high %v954_v37, %v954_v37  ;;  %v996_v45 = vrot.slane %v4412_v18, %v3659_v5  ;;  %v2236_v46 = vrot.slane %v923_v40, %v3667_v7 }
  0x7e   : > { %3236 = vst.msk [vmem:[%s3696_s16 + $0x18c] sm:$0x3] %vm3037_vm0, %v2168_v55  ;;  %3252 = vst.msk [vmem:[%s3696_s16 + $0x1ac] sm:$0x3] %vm3037_vm0, %v2168_v55  ;;  %v968_v47 = vrot.slane %v940_v41, %v3659_v5  ;;  %v988_v48 = vcombine.high %v4412_v18, %v4412_v18  ;;  %v973_v49 = vcombine.high %v4398_v19, %v4398_v19 }
  0x7f   : > { %3239 = vst.msk [vmem:[%s3696_s16 + $0x192] sm:$0x3] %vm3037_vm0, %v2180_v58  ;;  %3255 = vst.msk [vmem:[%s3696_s16 + $0x1b2] sm:$0x3] %vm3037_vm0, %v2180_v58  ;;  %v2264_v51 = vrot.slane %v970_v44, %v3667_v7  ;;  %v2272_v52 = vrot.slane %v996_v45, %v3667_v7  ;;  %v1018_v53 = vcombine.high %v996_v45, %v996_v45 }
  0x80   : > { %3240 = vst.msk [vmem:[%s3696_s16 + $0x194] sm:$0x3] %vm3037_vm0, %v2184_v59  ;;  %3256 = vst.msk [vmem:[%s3696_s16 + $0x1b4] sm:$0x3] %vm3037_vm0, %v2184_v59  ;;  %v1029_v54 = vrot.slane %v142_v50, %v3659_v5  ;;  %v2260_v55 = vrot.slane %v968_v47, %v3667_v7  ;;  %v972_v56 = vcombine.high %v968_v47, %v968_v47 }
  0x81   : > { %3242 = vst.msk [vmem:[%s3696_s16 + $0x198] sm:$0x3] %vm3037_vm0, %v2192_v61  ;;  %3258 = vst.msk [vmem:[%s3696_s16 + $0x1b8] sm:$0x3] %vm3037_vm0, %v2192_v61  ;;  %v1010_v57 = vrot.slane %v988_v48, %v3659_v5  ;;  %v987_v58 = vrot.slane %v973_v49, %v3659_v5  ;;  %v2280_v59 = vrot.slane %v1018_v53, %v3667_v7 }
  0x82   : > { %3237 = vst.msk [vmem:[%s3696_s16 + $0x18e] sm:$0x3] %vm3037_vm0, %v2172_v62  ;;  %3253 = vst.msk [vmem:[%s3696_s16 + $0x1ae] sm:$0x3] %vm3037_vm0, %v2172_v62  ;;  %v1045_v60 = vrot.slane %v1029_v54, %v3659_v5  ;;  %v1037_v61 = vcombine.high %v1029_v54, %v1029_v54  ;;  %v1022_v62 = vcombine.high %v142_v50, %v142_v50 }
  0x83   : > { %3262 = vst.msk [vmem:[%s3696_s16 + $0x1c0] sm:$0x3] %vm3037_vm0, %v2208_v1  ;;  %3278 = vst.msk [vmem:[%s3696_s16 + $0x1e0] sm:$0x3] %vm3037_vm0, %v2208_v1  ;;  %v2268_v63 = vrot.slane %v972_v56, %v3667_v7  ;;  %v2276_v0 = vrot.slane %v1010_v57, %v3667_v7  ;;  %v1020_v1 = vcombine.high %v1010_v57, %v1010_v57 }
  0x84   : > { %3241 = vst.msk [vmem:[%s3696_s16 + $0x196] sm:$0x3] %vm3037_vm0, %v2188_v3  ;;  %3257 = vst.msk [vmem:[%s3696_s16 + $0x1b6] sm:$0x3] %vm3037_vm0, %v2188_v3  ;;  %v1003_v2 = vrot.slane %v987_v58, %v3659_v5  ;;  %v989_v3 = vcombine.high %v987_v58, %v987_v58  ;;  %v2304_v4 = vrot.slane %v1045_v60, %v3667_v7 }
  0x85   : > { %3243 = vst.msk [vmem:[%s3696_s16 + $0x19a] sm:$0x3] %vm3037_vm0, %v2196_v9  ;;  %3259 = vst.msk [vmem:[%s3696_s16 + $0x1ba] sm:$0x3] %vm3037_vm0, %v2196_v9  ;;  %v1059_v6 = vrot.slane %v1037_v61, %v3659_v5  ;;  %v1067_v8 = vcombine.high %v1045_v60, %v1045_v60  ;;  %v2284_v9 = vrot.slane %v1020_v1, %v3667_v7 }
  0x86   : > { %3244 = vst.msk [vmem:[%s3696_s16 + $0x19c] sm:$0x3] %vm3037_vm0, %v2200_v10  ;;  %3260 = vst.msk [vmem:[%s3696_s16 + $0x1bc] sm:$0x3] %vm3037_vm0, %v2200_v10  ;;  %v2288_v10 = vrot.slane %v1003_v2, %v3667_v7  ;;  %v1019_v11 = vcombine.high %v1003_v2, %v1003_v2  ;;  %v1036_v12 = vrot.slane %v1022_v62, %v3659_v5 }
  0x87   : > { %3264 = vst.msk [vmem:[%s3696_s16 + $0x1c4] sm:$0x3] %vm3037_vm0, %v2216_v15  ;;  %3280 = vst.msk [vmem:[%s3696_s16 + $0x1e4] sm:$0x3] %vm3037_vm0, %v2216_v15  ;;  %v1017_v15 = vrot.slane %v989_v3, %v3659_v5  ;;  %v2308_v16 = vrot.slane %v1059_v6, %v3667_v7  ;;  %v2312_v17 = vrot.slane %v1067_v8, %v3667_v7 }
  0x88   : > { %3245 = vst.msk [vmem:[%s3696_s16 + $0x19e] sm:$0x3] %vm3037_vm0, %v2204_v20  ;;  %3261 = vst.msk [vmem:[%s3696_s16 + $0x1be] sm:$0x3] %vm3037_vm0, %v2204_v20  ;;  %v1069_v19 = vcombine.high %v1059_v6, %v1059_v6  ;;  %v2296_v20 = vrot.slane %v1019_v11, %v3667_v7  ;;  %v1052_v21 = vrot.slane %v1036_v12, %v3659_v5 }
  0x89   : > { %3263 = vst.msk [vmem:[%s3696_s16 + $0x1c2] sm:$0x3] %vm3037_vm0, %v2212_v22  ;;  %3279 = vst.msk [vmem:[%s3696_s16 + $0x1e2] sm:$0x3] %vm3037_vm0, %v2212_v22  ;;  %v1038_v14 = vcombine.high %v1036_v12, %v1036_v12  ;;  %v1078_v18 = vrot.slane %v143_v13, %v3659_v5  ;;  %v2292_v22 = vrot.slane %v1017_v15, %v3667_v7 }
  0x8a   : > { %3270 = vst.msk [vmem:[%s3696_s16 + $0x1d0] sm:$0x3] %vm3037_vm0, %v2240_v26  ;;  %3286 = vst.msk [vmem:[%s3696_s16 + $0x1f0] sm:$0x3] %vm3037_vm0, %v2240_v26  ;;  %v1021_v23 = vcombine.high %v1017_v15, %v1017_v15  ;;  %v2316_v24 = vrot.slane %v1069_v19, %v3667_v7  ;;  %v1071_v25 = vcombine.high %v143_v13, %v143_v13 }
  0x8b   : > { %3265 = vst.msk [vmem:[%s3696_s16 + $0x1c6] sm:$0x3] %vm3037_vm0, %v2220_v30  ;;  %3281 = vst.msk [vmem:[%s3696_s16 + $0x1e6] sm:$0x3] %vm3037_vm0, %v2220_v30  ;;  %v2320_v26 = vrot.slane %v1052_v21, %v3667_v7  ;;  %v1066_v27 = vrot.slane %v1038_v14, %v3659_v5  ;;  %v1068_v28 = vcombine.high %v1052_v21, %v1052_v21  ;;  %v144_v30 = vld [vmem:[%s3664_s12 + $0x98] sm:$0xff] }
  0x8c   : > { %3266 = vst.msk [vmem:[%s3696_s16 + $0x1c8] sm:$0x3] %vm3037_vm0, %v2224_v31  ;;  %3282 = vst.msk [vmem:[%s3696_s16 + $0x1e8] sm:$0x3] %vm3037_vm0, %v2224_v31  ;;  %v1094_v29 = vrot.slane %v1078_v18, %v3659_v5  ;;  %v2300_v31 = vrot.slane %v1021_v23, %v3667_v7  ;;  %v1086_v32 = vcombine.high %v1078_v18, %v1078_v18 }
  0x8d   : > { %3271 = vst.msk [vmem:[%s3696_s16 + $0x1d2] sm:$0x3] %vm3037_vm0, %v2244_v34  ;;  %3287 = vst.msk [vmem:[%s3696_s16 + $0x1f2] sm:$0x3] %vm3037_vm0, %v2244_v34  ;;  %v1085_v33 = vrot.slane %v1071_v25, %v3659_v5  ;;  %v1127_v34 = vrot.slane %v144_v30, %v3659_v5  ;;  %v2328_v36 = vrot.slane %v1068_v28, %v3667_v7 }
  0x8e   : > { %3272 = vst.msk [vmem:[%s3696_s16 + $0x1d4] sm:$0x3] %vm3037_vm0, %v2248_v35  ;;  %3288 = vst.msk [vmem:[%s3696_s16 + $0x1f4] sm:$0x3] %vm3037_vm0, %v2248_v35  ;;  %v2324_v35 = vrot.slane %v1066_v27, %v3667_v7  ;;  %v1070_v37 = vcombine.high %v1066_v27, %v1066_v27  ;;  %v1116_v40 = vcombine.high %v1094_v29, %v1094_v29 }
  0x8f   : > { %3267 = vst.msk [vmem:[%s3696_s16 + $0x1ca] sm:$0x3] %vm3037_vm0, %v2228_v38  ;;  %3283 = vst.msk [vmem:[%s3696_s16 + $0x1ea] sm:$0x3] %vm3037_vm0, %v2228_v38  ;;  %v2336_v38 = vrot.slane %v1094_v29, %v3667_v7  ;;  %v1101_v41 = vrot.slane %v1085_v33, %v3659_v5  ;;  %v1143_v44 = vrot.slane %v1127_v34, %v3659_v5 }
  0x90   : > { %3268 = vst.msk [vmem:[%s3696_s16 + $0x1cc] sm:$0x3] %vm3037_vm0, %v2232_v39  ;;  %3284 = vst.msk [vmem:[%s3696_s16 + $0x1ec] sm:$0x3] %vm3037_vm0, %v2232_v39  ;;  %v1108_v39 = vrot.slane %v1086_v32, %v3659_v5  ;;  %v1135_v45 = vcombine.high %v1127_v34, %v1127_v34  ;;  %v2344_v48 = vrot.slane %v1116_v40, %v3667_v7 }
  0x91   : > { %3273 = vst.msk [vmem:[%s3696_s16 + $0x1d6] sm:$0x3] %vm3037_vm0, %v2252_v42  ;;  %3289 = vst.msk [vmem:[%s3696_s16 + $0x1f6] sm:$0x3] %vm3037_vm0, %v2252_v42  ;;  %v1087_v42 = vcombine.high %v1085_v33, %v1085_v33  ;;  %v2352_v50 = vrot.slane %v1101_v41, %v3667_v7  ;;  %v2368_v53 = vrot.slane %v1143_v44, %v3667_v7 }
  0x92   : > { %3274 = vst.msk [vmem:[%s3696_s16 + $0x1d8] sm:$0x3] %vm3037_vm0, %v2256_v43  ;;  %3290 = vst.msk [vmem:[%s3696_s16 + $0x1f8] sm:$0x3] %vm3037_vm0, %v2256_v43  ;;  %v2332_v43 = vrot.slane %v1070_v37, %v3667_v7  ;;  %v2340_v47 = vrot.slane %v1108_v39, %v3667_v7  ;;  %v1118_v49 = vcombine.high %v1108_v39, %v1108_v39 }
  0x93   : > { %3269 = vst.msk [vmem:[%s3696_s16 + $0x1ce] sm:$0x3] %vm3037_vm0, %v2236_v46  ;;  %3285 = vst.msk [vmem:[%s3696_s16 + $0x1ee] sm:$0x3] %vm3037_vm0, %v2236_v46  ;;  %v1120_v46 = vcombine.high %v144_v30, %v144_v30  ;;  %v1157_v54 = vrot.slane %v1135_v45, %v3659_v5  ;;  %v1165_v57 = vcombine.high %v1143_v44, %v1143_v44 }
  0x94   : > { %3276 = vst.msk [vmem:[%s3696_s16 + $0x1dc] sm:$0x3] %vm3037_vm0, %v2264_v51  ;;  %3292 = vst.msk [vmem:[%s3696_s16 + $0x1fc] sm:$0x3] %vm3037_vm0, %v2264_v51  ;;  %v1115_v51 = vrot.slane %v1087_v42, %v3659_v5  ;;  %v2348_v56 = vrot.slane %v1118_v49, %v3667_v7 }
  0x95   : > { %3294 = vst.msk [vmem:[%s3696_s16 + $0x200] sm:$0x3] %vm3037_vm0, %v2272_v52  ;;  %3310 = vst.msk [vmem:[%s3696_s16 + $0x220] sm:$0x3] %vm3037_vm0, %v2272_v52  ;;  %v1117_v52 = vcombine.high %v1101_v41, %v1101_v41  ;;  %v1134_v58 = vrot.slane %v1120_v46, %v3659_v5  ;;  %v1167_v1 = vcombine.high %v1157_v54, %v1157_v54 }
  0x96   : > { %3275 = vst.msk [vmem:[%s3696_s16 + $0x1da] sm:$0x3] %vm3037_vm0, %v2260_v55  ;;  %3291 = vst.msk [vmem:[%s3696_s16 + $0x1fa] sm:$0x3] %vm3037_vm0, %v2260_v55  ;;  %v145_v55 = vld [vmem:[%s3664_s12 + $0xa0] sm:$0xff]  ;;  %v2356_v60 = vrot.slane %v1115_v51, %v3667_v7  ;;  %v1119_v62 = vcombine.high %v1115_v51, %v1115_v51 }
  0x97   : > { %3296 = vst.msk [vmem:[%s3696_s16 + $0x204] sm:$0x3] %vm3037_vm0, %v2280_v59  ;;  %3312 = vst.msk [vmem:[%s3696_s16 + $0x224] sm:$0x3] %vm3037_vm0, %v2280_v59  ;;  %v1176_v59 = vrot.slane %v145_v55, %v3659_v5  ;;  %v2360_v61 = vrot.slane %v1117_v52, %v3667_v7  ;;  %v1150_v2 = vrot.slane %v1134_v58, %v3659_v5  ;;  %v4744_v52 = vld [vmem:[%s3664_s12 + $0xb8] sm:$0xff] }
  0x98   : > { %3277 = vst.msk [vmem:[%s3696_s16 + $0x1de] sm:$0x3] %vm3037_vm0, %v2268_v63  ;;  %3293 = vst.msk [vmem:[%s3696_s16 + $0x1fe] sm:$0x3] %vm3037_vm0, %v2268_v63  ;;  %v2372_v63 = vrot.slane %v1157_v54, %v3667_v7  ;;  %v1136_v3 = vcombine.high %v1134_v58, %v1134_v58 }
  0x99   : > { %3295 = vst.msk [vmem:[%s3696_s16 + $0x202] sm:$0x3] %vm3037_vm0, %v2276_v0  ;;  %3311 = vst.msk [vmem:[%s3696_s16 + $0x222] sm:$0x3] %vm3037_vm0, %v2276_v0  ;;  %v2376_v0 = vrot.slane %v1165_v57, %v3667_v7  ;;  %v1192_v6 = vrot.slane %v1176_v59, %v3659_v5  ;;  %v1184_v8 = vcombine.high %v1176_v59, %v1176_v59 }
  0x9a   : > { %3302 = vst.msk [vmem:[%s3696_s16 + $0x210] sm:$0x3] %vm3037_vm0, %v2304_v4  ;;  %3318 = vst.msk [vmem:[%s3696_s16 + $0x230] sm:$0x3] %vm3037_vm0, %v2304_v4  ;;  %v2364_v4 = vrot.slane %v1119_v62, %v3667_v7  ;;  %v2384_v11 = vrot.slane %v1150_v2, %v3667_v7  ;;  %v1164_v12 = vrot.slane %v1136_v3, %v3659_v5 }
  0x9b   : > { %3297 = vst.msk [vmem:[%s3696_s16 + $0x206] sm:$0x3] %vm3037_vm0, %v2284_v9  ;;  %3313 = vst.msk [vmem:[%s3696_s16 + $0x226] sm:$0x3] %vm3037_vm0, %v2284_v9  ;;  %v1169_v9 = vcombine.high %v145_v55, %v145_v55  ;;  %v1166_v13 = vcombine.high %v1150_v2, %v1150_v2  ;;  %v2400_v15 = vrot.slane %v1192_v6, %v3667_v7 }
  0x9c   : > { %3298 = vst.msk [vmem:[%s3696_s16 + $0x208] sm:$0x3] %vm3037_vm0, %v2288_v10  ;;  %3314 = vst.msk [vmem:[%s3696_s16 + $0x228] sm:$0x3] %vm3037_vm0, %v2288_v10  ;;  %v2380_v10 = vrot.slane %v1167_v1, %v3667_v7  ;;  %v2388_v21 = vrot.slane %v1164_v12, %v3667_v7  ;;  %v1168_v18 = vcombine.high %v1164_v12, %v1164_v12 }
  0x9d   : > { %3303 = vst.msk [vmem:[%s3696_s16 + $0x212] sm:$0x3] %vm3037_vm0, %v2308_v16  ;;  %3319 = vst.msk [vmem:[%s3696_s16 + $0x232] sm:$0x3] %vm3037_vm0, %v2308_v16  ;;  %v1206_v16 = vrot.slane %v1184_v8, %v3659_v5  ;;  %v1183_v19 = vrot.slane %v1169_v9, %v3659_v5  ;;  %v2392_v14 = vrot.slane %v1166_v13, %v3667_v7 }
  0x9e   : > { %3304 = vst.msk [vmem:[%s3696_s16 + $0x214] sm:$0x3] %vm3037_vm0, %v2312_v17  ;;  %3320 = vst.msk [vmem:[%s3696_s16 + $0x234] sm:$0x3] %vm3037_vm0, %v2312_v17  ;;  %v1214_v17 = vcombine.high %v1192_v6, %v1192_v6  ;;  %v2396_v27 = vrot.slane %v1168_v18, %v3667_v7 }
  0x9f   : > { %3300 = vst.msk [vmem:[%s3696_s16 + $0x20c] sm:$0x3] %vm3037_vm0, %v2296_v20  ;;  %3316 = vst.msk [vmem:[%s3696_s16 + $0x22c] sm:$0x3] %vm3037_vm0, %v2296_v20  ;;  %v146_v20 = vld [vmem:[%s3664_s12 + $0xa8] sm:$0xff]  ;;  %v2404_v23 = vrot.slane %v1206_v16, %v3667_v7  ;;  %v1216_v25 = vcombine.high %v1206_v16, %v1206_v16  ;;  %v1185_v28 = vcombine.high %v1183_v19, %v1183_v19  ;;  %v149_v16 = vld [vmem:[%s3664_s12 + $0xc0] sm:$0xff] }
  0xa0   : > { %3299 = vst.msk [vmem:[%s3696_s16 + $0x20a] sm:$0x3] %vm3037_vm0, %v2292_v22  ;;  %3315 = vst.msk [vmem:[%s3696_s16 + $0x22a] sm:$0x3] %vm3037_vm0, %v2292_v22  ;;  %v1225_v22 = vrot.slane %v146_v20, %v3659_v5 }
  0xa1   : > { %3305 = vst.msk [vmem:[%s3696_s16 + $0x216] sm:$0x3] %vm3037_vm0, %v2316_v24  ;;  %3321 = vst.msk [vmem:[%s3696_s16 + $0x236] sm:$0x3] %vm3037_vm0, %v2316_v24  ;;  %v2408_v24 = vrot.slane %v1214_v17, %v3667_v7  ;;  %v2412_v32 = vrot.slane %v1216_v25, %v3667_v7 }
  0xa2   : > { %3306 = vst.msk [vmem:[%s3696_s16 + $0x218] sm:$0x3] %vm3037_vm0, %v2320_v26  ;;  %3322 = vst.msk [vmem:[%s3696_s16 + $0x238] sm:$0x3] %vm3037_vm0, %v2320_v26  ;;  %v1199_v26 = vrot.slane %v1183_v19, %v3659_v5  ;;  %v1241_v29 = vrot.slane %v1225_v22, %v3659_v5  ;;  %v1233_v30 = vcombine.high %v1225_v22, %v1225_v22 }
  0xa3   : > { %3301 = vst.msk [vmem:[%s3696_s16 + $0x20e] sm:$0x3] %vm3037_vm0, %v2300_v31  ;;  %3317 = vst.msk [vmem:[%s3696_s16 + $0x22e] sm:$0x3] %vm3037_vm0, %v2300_v31  ;;  %v147_v31 = vld [vmem:[%s3664_s12 + $0xb0] sm:$0xff] }
  0xa4   : > { %3307 = vst.msk [vmem:[%s3696_s16 + $0x21a] sm:$0x3] %vm3037_vm0, %v2324_v35  ;;  %3323 = vst.msk [vmem:[%s3696_s16 + $0x23a] sm:$0x3] %vm3037_vm0, %v2324_v35  ;;  %v2416_v33 = vrot.slane %v1199_v26, %v3667_v7  ;;  %v1215_v34 = vcombine.high %v1199_v26, %v1199_v26  ;;  %v1218_v35 = vcombine.high %v146_v20, %v146_v20 }
  0xa5   : > { %3308 = vst.msk [vmem:[%s3696_s16 + $0x21c] sm:$0x3] %vm3037_vm0, %v2328_v36  ;;  %3324 = vst.msk [vmem:[%s3696_s16 + $0x23c] sm:$0x3] %vm3037_vm0, %v2328_v36  ;;  %v1213_v36 = vrot.slane %v1185_v28, %v3659_v5  ;;  %v2432_v37 = vrot.slane %v1241_v29, %v3667_v7  ;;  %v1263_v39 = vcombine.high %v1241_v29, %v1241_v29  ;;  %v4832_v28 = vld [vmem:[%s3664_s12 + $0xc8] sm:$0xff] }
  0xa6   : > { %3326 = vst.msk [vmem:[%s3696_s16 + $0x240] sm:$0x3] %vm3037_vm0, %v2336_v38  ;;  %3342 = vst.msk [vmem:[%s3696_s16 + $0x260] sm:$0x3] %vm3037_vm0, %v2336_v38  ;;  %v1255_v38 = vrot.slane %v1233_v30, %v3659_v5  ;;  %v2424_v40 = vrot.slane %v1215_v34, %v3667_v7  ;;  %v1232_v41 = vrot.slane %v1218_v35, %v3659_v5 }
  0xa7   : > { %3309 = vst.msk [vmem:[%s3696_s16 + $0x21e] sm:$0x3] %vm3037_vm0, %v2332_v43  ;;  %3325 = vst.msk [vmem:[%s3696_s16 + $0x23e] sm:$0x3] %vm3037_vm0, %v2332_v43  ;;  %v1274_v42 = vrot.slane %v147_v31, %v3659_v5  ;;  %v1267_v43 = vcombine.high %v147_v31, %v147_v31  ;;  %v2420_v44 = vrot.slane %v1213_v36, %v3667_v7 }
  0xa8   : > { %3327 = vst.msk [vmem:[%s3696_s16 + $0x242] sm:$0x3] %vm3037_vm0, %v2340_v47  ;;  %3343 = vst.msk [vmem:[%s3696_s16 + $0x262] sm:$0x3] %vm3037_vm0, %v2340_v47  ;;  %v1217_v45 = vcombine.high %v1213_v36, %v1213_v36  ;;  %v2436_v46 = vrot.slane %v1255_v38, %v3667_v7  ;;  %v2440_v47 = vrot.slane %v1263_v39, %v3667_v7 }
  0xa9   : > { %3328 = vst.msk [vmem:[%s3696_s16 + $0x244] sm:$0x3] %vm3037_vm0, %v2344_v48  ;;  %3344 = vst.msk [vmem:[%s3696_s16 + $0x264] sm:$0x3] %vm3037_vm0, %v2344_v48  ;;  %v1265_v48 = vcombine.high %v1255_v38, %v1255_v38  ;;  %v1248_v49 = vrot.slane %v1232_v41, %v3659_v5  ;;  %v1290_v51 = vrot.slane %v1274_v42, %v3659_v5 }
  0xaa   : > { %3330 = vst.msk [vmem:[%s3696_s16 + $0x248] sm:$0x3] %vm3037_vm0, %v2352_v50  ;;  %3346 = vst.msk [vmem:[%s3696_s16 + $0x268] sm:$0x3] %vm3037_vm0, %v2352_v50  ;;  %v1234_v50 = vcombine.high %v1232_v41, %v1232_v41  ;;  %v1282_v54 = vcombine.high %v1274_v42, %v1274_v42  ;;  %v1281_v55 = vrot.slane %v1267_v43, %v3659_v5 }
  0xab   : > { %3334 = vst.msk [vmem:[%s3696_s16 + $0x250] sm:$0x3] %vm3037_vm0, %v2368_v53  ;;  %3350 = vst.msk [vmem:[%s3696_s16 + $0x270] sm:$0x3] %vm3037_vm0, %v2368_v53  ;;  %v2428_v53 = vrot.slane %v1217_v45, %v3667_v7  ;;  %v2444_v57 = vrot.slane %v1265_v48, %v3667_v7  ;;  %v2448_v58 = vrot.slane %v1248_v49, %v3667_v7 }
  0xac   : > { %3329 = vst.msk [vmem:[%s3696_s16 + $0x246] sm:$0x3] %vm3037_vm0, %v2348_v56  ;;  %3345 = vst.msk [vmem:[%s3696_s16 + $0x266] sm:$0x3] %vm3037_vm0, %v2348_v56  ;;  %v1323_v56 = vrot.slane %v4744_v52, %v3659_v5  ;;  %v1262_v59 = vrot.slane %v1234_v50, %v3659_v5  ;;  %v1304_v62 = vrot.slane %v1282_v54, %v3659_v5 }
  0xad   : > { %3331 = vst.msk [vmem:[%s3696_s16 + $0x24a] sm:$0x3] %vm3037_vm0, %v2356_v60  ;;  %3347 = vst.msk [vmem:[%s3696_s16 + $0x26a] sm:$0x3] %vm3037_vm0, %v2356_v60  ;;  %v1264_v60 = vcombine.high %v1248_v49, %v1248_v49  ;;  %v1316_v20 = vcombine.high %v4744_v52, %v4744_v52  ;;  %v1365_v31 = vcombine.high %v149_v16, %v149_v16 }
  0xae   : > { %3332 = vst.msk [vmem:[%s3696_s16 + $0x24c] sm:$0x3] %vm3037_vm0, %v2360_v61  ;;  %3348 = vst.msk [vmem:[%s3696_s16 + $0x26c] sm:$0x3] %vm3037_vm0, %v2360_v61  ;;  %v2464_v61 = vrot.slane %v1290_v51, %v3667_v7  ;;  %v2452_v1 = vrot.slane %v1262_v59, %v3667_v7  ;;  %v1266_v3 = vcombine.high %v1262_v59, %v1262_v59 }
  0xaf   : > { %3335 = vst.msk [vmem:[%s3696_s16 + $0x252] sm:$0x3] %vm3037_vm0, %v2372_v63  ;;  %3351 = vst.msk [vmem:[%s3696_s16 + $0x272] sm:$0x3] %vm3037_vm0, %v2372_v63  ;;  %v1312_v63 = vcombine.high %v1290_v51, %v1290_v51  ;;  %v2456_v2 = vrot.slane %v1264_v60, %v3667_v7  ;;  %v2468_v6 = vrot.slane %v1304_v62, %v3667_v7 }
  0xb0   : > { %3336 = vst.msk [vmem:[%s3696_s16 + $0x254] sm:$0x3] %vm3037_vm0, %v2376_v0  ;;  %3352 = vst.msk [vmem:[%s3696_s16 + $0x274] sm:$0x3] %vm3037_vm0, %v2376_v0  ;;  %v1297_v0 = vrot.slane %v1281_v55, %v3659_v5  ;;  %v1314_v9 = vcombine.high %v1304_v62, %v1304_v62  ;;  %v1331_v19 = vcombine.high %v1323_v56, %v1323_v56 }
  0xb1   : > { %3333 = vst.msk [vmem:[%s3696_s16 + $0x24e] sm:$0x3] %vm3037_vm0, %v2364_v4  ;;  %3349 = vst.msk [vmem:[%s3696_s16 + $0x26e] sm:$0x3] %vm3037_vm0, %v2364_v4  ;;  %v1283_v4 = vcombine.high %v1281_v55, %v1281_v55  ;;  %v2472_v8 = vrot.slane %v1312_v63, %v3667_v7  ;;  %v1330_v26 = vrot.slane %v1316_v20, %v3659_v5 }
  0xb2   : > { %3337 = vst.msk [vmem:[%s3696_s16 + $0x256] sm:$0x3] %vm3037_vm0, %v2380_v10  ;;  %3353 = vst.msk [vmem:[%s3696_s16 + $0x276] sm:$0x3] %vm3037_vm0, %v2380_v10  ;;  %v2480_v10 = vrot.slane %v1297_v0, %v3667_v7  ;;  %v1313_v13 = vcombine.high %v1297_v0, %v1297_v0  ;;  %v2476_v17 = vrot.slane %v1314_v9, %v3667_v7 }
  0xb3   : > { %3338 = vst.msk [vmem:[%s3696_s16 + $0x258] sm:$0x3] %vm3037_vm0, %v2384_v11  ;;  %3354 = vst.msk [vmem:[%s3696_s16 + $0x278] sm:$0x3] %vm3037_vm0, %v2384_v11  ;;  %v2460_v11 = vrot.slane %v1266_v3, %v3667_v7  ;;  %v1311_v12 = vrot.slane %v1283_v4, %v3659_v5  ;;  %v1346_v36 = vrot.slane %v1330_v26, %v3659_v5 }
  0xb4   : > { %3358 = vst.msk [vmem:[%s3696_s16 + $0x280] sm:$0x3] %vm3037_vm0, %v2400_v15  ;;  %3374 = vst.msk [vmem:[%s3696_s16 + $0x2a0] sm:$0x3] %vm3037_vm0, %v2400_v15  ;;  %v1339_v15 = vrot.slane %v1323_v56, %v3659_v5  ;;  %v2488_v18 = vrot.slane %v1313_v13, %v3667_v7  ;;  %v1414_v0 = vcombine.high %v4832_v28, %v4832_v28 }
  0xb5   : > { %3339 = vst.msk [vmem:[%s3696_s16 + $0x25a] sm:$0x3] %vm3037_vm0, %v2388_v21  ;;  %3355 = vst.msk [vmem:[%s3696_s16 + $0x27a] sm:$0x3] %vm3037_vm0, %v2388_v21  ;;  %v1372_v21 = vrot.slane %v149_v16, %v3659_v5  ;;  %v1315_v22 = vcombine.high %v1311_v12, %v1311_v12  ;;  %v2512_v42 = vrot.slane %v1346_v36, %v3667_v7 }
  0xb6   : > { %3340 = vst.msk [vmem:[%s3696_s16 + $0x25c] sm:$0x3] %vm3037_vm0, %v2392_v14  ;;  %3356 = vst.msk [vmem:[%s3696_s16 + $0x27c] sm:$0x3] %vm3037_vm0, %v2392_v14  ;;  %v2484_v14 = vrot.slane %v1311_v12, %v3667_v7  ;;  %v1361_v25 = vcombine.high %v1339_v15, %v1339_v15  ;;  %v1362_v43 = vcombine.high %v1346_v36, %v1346_v36 }
  0xb7   : > { %3359 = vst.msk [vmem:[%s3696_s16 + $0x282] sm:$0x3] %vm3037_vm0, %v2404_v23  ;;  %3375 = vst.msk [vmem:[%s3696_s16 + $0x2a2] sm:$0x3] %vm3037_vm0, %v2404_v23  ;;  %v2496_v23 = vrot.slane %v1339_v15, %v3667_v7  ;;  %v2492_v29 = vrot.slane %v1315_v22, %v3667_v7  ;;  %v1380_v30 = vcombine.high %v1372_v21, %v1372_v21 }
  0xb8   : > { %3360 = vst.msk [vmem:[%s3696_s16 + $0x284] sm:$0x3] %vm3037_vm0, %v2408_v24  ;;  %3376 = vst.msk [vmem:[%s3696_s16 + $0x2a4] sm:$0x3] %vm3037_vm0, %v2408_v24  ;;  %v1353_v24 = vrot.slane %v1331_v19, %v3659_v5  ;;  %v2504_v34 = vrot.slane %v1361_v25, %v3667_v7  ;;  %v2520_v49 = vrot.slane %v1362_v43, %v3667_v7 }
  0xb9   : > { %3341 = vst.msk [vmem:[%s3696_s16 + $0x25e] sm:$0x3] %vm3037_vm0, %v2396_v27  ;;  %3357 = vst.msk [vmem:[%s3696_s16 + $0x27e] sm:$0x3] %vm3037_vm0, %v2396_v27  ;;  %v1388_v27 = vrot.slane %v1372_v21, %v3659_v5  ;;  %v1402_v39 = vrot.slane %v1380_v30, %v3659_v5 }
  0xba   : > { %3361 = vst.msk [vmem:[%s3696_s16 + $0x286] sm:$0x3] %vm3037_vm0, %v2412_v32  ;;  %3377 = vst.msk [vmem:[%s3696_s16 + $0x2a6] sm:$0x3] %vm3037_vm0, %v2412_v32  ;;  %v1421_v32 = vrot.slane %v4832_v28, %v3659_v5  ;;  %v1363_v35 = vcombine.high %v1353_v24, %v1353_v24 }
  0xbb   : > { %3362 = vst.msk [vmem:[%s3696_s16 + $0x288] sm:$0x3] %vm3037_vm0, %v2416_v33  ;;  %3378 = vst.msk [vmem:[%s3696_s16 + $0x2a8] sm:$0x3] %vm3037_vm0, %v2416_v33  ;;  %v2500_v33 = vrot.slane %v1353_v24, %v3667_v7  ;;  %v2528_v38 = vrot.slane %v1388_v27, %v3667_v7  ;;  %v1412_v48 = vcombine.high %v1402_v39, %v1402_v39 }
  0xbc   : > { %3366 = vst.msk [vmem:[%s3696_s16 + $0x290] sm:$0x3] %vm3037_vm0, %v2432_v37  ;;  %3382 = vst.msk [vmem:[%s3696_s16 + $0x2b0] sm:$0x3] %vm3037_vm0, %v2432_v37  ;;  %v1332_v37 = vcombine.high %v1330_v26, %v1330_v26  ;;  %v2508_v41 = vrot.slane %v1363_v35, %v3667_v7  ;;  %v1437_v52 = vrot.slane %v1421_v32, %v3659_v5 }
  0xbd   : > { %3364 = vst.msk [vmem:[%s3696_s16 + $0x28c] sm:$0x3] %vm3037_vm0, %v2424_v40  ;;  %3380 = vst.msk [vmem:[%s3696_s16 + $0x2ac] sm:$0x3] %vm3037_vm0, %v2424_v40  ;;  %v1410_v40 = vcombine.high %v1388_v27, %v1388_v27  ;;  %v2540_v55 = vrot.slane %v1412_v48, %v3667_v7  ;;  %v1429_v56 = vcombine.high %v1421_v32, %v1421_v32 }
  0xbe   : > { %3363 = vst.msk [vmem:[%s3696_s16 + $0x28a] sm:$0x3] %vm3037_vm0, %v2420_v44  ;;  %3379 = vst.msk [vmem:[%s3696_s16 + $0x2aa] sm:$0x3] %vm3037_vm0, %v2420_v44  ;;  %v1379_v44 = vrot.slane %v1365_v31, %v3659_v5  ;;  %v1360_v45 = vrot.slane %v1332_v37, %v3659_v5  ;;  %v2560_v60 = vrot.slane %v1437_v52, %v3667_v7  ;;  %v153_v37 = vld [vmem:[%s3664_s12 + $0xe0] sm:$0xff] }
  0xbf   : > { %3367 = vst.msk [vmem:[%s3696_s16 + $0x292] sm:$0x3] %vm3037_vm0, %v2436_v46  ;;  %3383 = vst.msk [vmem:[%s3696_s16 + $0x2b2] sm:$0x3] %vm3037_vm0, %v2436_v46  ;;  %v2532_v46 = vrot.slane %v1402_v39, %v3667_v7  ;;  %v1451_v62 = vrot.slane %v1429_v56, %v3659_v5  ;;  %v1459_v63 = vcombine.high %v1437_v52, %v1437_v52 }
  0xc0   : > { %3368 = vst.msk [vmem:[%s3696_s16 + $0x294] sm:$0x3] %vm3037_vm0, %v2440_v47  ;;  %3384 = vst.msk [vmem:[%s3696_s16 + $0x2b4] sm:$0x3] %vm3037_vm0, %v2440_v47  ;;  %v2536_v47 = vrot.slane %v1410_v40, %v3667_v7  ;;  %v1395_v50 = vrot.slane %v1379_v44, %v3659_v5  ;;  %v1381_v51 = vcombine.high %v1379_v44, %v1379_v44 }
  0xc1   : > { %3365 = vst.msk [vmem:[%s3696_s16 + $0x28e] sm:$0x3] %vm3037_vm0, %v2428_v53  ;;  %3381 = vst.msk [vmem:[%s3696_s16 + $0x2ae] sm:$0x3] %vm3037_vm0, %v2428_v53  ;;  %v2516_v53 = vrot.slane %v1360_v45, %v3667_v7  ;;  %v1364_v54 = vcombine.high %v1360_v45, %v1360_v45  ;;  %v2568_v9 = vrot.slane %v1459_v63, %v3667_v7 }
  0xc2   : > { %3369 = vst.msk [vmem:[%s3696_s16 + $0x296] sm:$0x3] %vm3037_vm0, %v2444_v57  ;;  %3385 = vst.msk [vmem:[%s3696_s16 + $0x2b6] sm:$0x3] %vm3037_vm0, %v2444_v57  ;;  %v2544_v57 = vrot.slane %v1395_v50, %v3667_v7  ;;  %v1411_v59 = vcombine.high %v1395_v50, %v1395_v50  ;;  %v1568_v48 = vrot.slane %v153_v37, %v3659_v5 }
  0xc3   : > { %3370 = vst.msk [vmem:[%s3696_s16 + $0x298] sm:$0x3] %vm3037_vm0, %v2448_v58  ;;  %3386 = vst.msk [vmem:[%s3696_s16 + $0x2b8] sm:$0x3] %vm3037_vm0, %v2448_v58  ;;  %v1409_v58 = vrot.slane %v1381_v51, %v3659_v5 }
  0xc4   : > { %3390 = vst.msk [vmem:[%s3696_s16 + $0x2c0] sm:$0x3] %vm3037_vm0, %v2464_v61  ;;  %3406 = vst.msk [vmem:[%s3696_s16 + $0x2e0] sm:$0x3] %vm3037_vm0, %v2464_v61  ;;  %v2524_v61 = vrot.slane %v1364_v54, %v3667_v7  ;;  %v2552_v3 = vrot.slane %v1411_v59, %v3667_v7  ;;  %v1576_v56 = vcombine.high %v1568_v48, %v1568_v48 }
  0xc5   : > { %3371 = vst.msk [vmem:[%s3696_s16 + $0x29a] sm:$0x3] %vm3037_vm0, %v2452_v1  ;;  %3387 = vst.msk [vmem:[%s3696_s16 + $0x2ba] sm:$0x3] %vm3037_vm0, %v2452_v1  ;;  %v151_v1 = vld [vmem:[%s3664_s12 + $0xd0] sm:$0xff]  ;;  %v1413_v4 = vcombine.high %v1409_v58, %v1409_v58 }
  0xc6   : > { %3372 = vst.msk [vmem:[%s3696_s16 + $0x29c] sm:$0x3] %vm3037_vm0, %v2456_v2  ;;  %3388 = vst.msk [vmem:[%s3696_s16 + $0x2bc] sm:$0x3] %vm3037_vm0, %v2456_v2  ;;  %v2548_v2 = vrot.slane %v1409_v58, %v3667_v7  ;;  %v1463_v16 = vcombine.high %v151_v1, %v151_v1  ;;  %v5040_v58 = vld [vmem:[%s3664_s12 + $0xe8] sm:$0xff] }
  0xc7   : > { %3391 = vst.msk [vmem:[%s3696_s16 + $0x2c2] sm:$0x3] %vm3037_vm0, %v2468_v6  ;;  %3407 = vst.msk [vmem:[%s3696_s16 + $0x2e2] sm:$0x3] %vm3037_vm0, %v2468_v6  ;;  %v1470_v6 = vrot.slane %v151_v1, %v3659_v5  ;;  %v2556_v12 = vrot.slane %v1413_v4, %v3667_v7 }
  0xc8   : > { %3392 = vst.msk [vmem:[%s3696_s16 + $0x2c4] sm:$0x3] %vm3037_vm0, %v2472_v8  ;;  %3408 = vst.msk [vmem:[%s3696_s16 + $0x2e4] sm:$0x3] %vm3037_vm0, %v2472_v8  ;;  %v2564_v8 = vrot.slane %v1451_v62, %v3667_v7  ;;  %v1477_v24 = vrot.slane %v1463_v16, %v3659_v5 }
  0xc9   : > { %3394 = vst.msk [vmem:[%s3696_s16 + $0x2c8] sm:$0x3] %vm3037_vm0, %v2480_v10  ;;  %3410 = vst.msk [vmem:[%s3696_s16 + $0x2e8] sm:$0x3] %vm3037_vm0, %v2480_v10  ;;  %v1461_v10 = vcombine.high %v1451_v62, %v1451_v62  ;;  %v1486_v13 = vrot.slane %v1470_v6, %v3659_v5  ;;  %v1478_v15 = vcombine.high %v1470_v6, %v1470_v6 }
  0xca   : > { %3373 = vst.msk [vmem:[%s3696_s16 + $0x29e] sm:$0x3] %vm3037_vm0, %v2460_v11  ;;  %3389 = vst.msk [vmem:[%s3696_s16 + $0x2be] sm:$0x3] %vm3037_vm0, %v2460_v11  ;;  %v1428_v11 = vrot.slane %v1414_v0, %v3659_v5  ;;  %v1493_v32 = vrot.slane %v1477_v24, %v3659_v5  ;;  %v1479_v36 = vcombine.high %v1477_v24, %v1477_v24 }
  0xcb   : > { %3393 = vst.msk [vmem:[%s3696_s16 + $0x2c6] sm:$0x3] %vm3037_vm0, %v2476_v17  ;;  %3409 = vst.msk [vmem:[%s3696_s16 + $0x2e6] sm:$0x3] %vm3037_vm0, %v2476_v17  ;;  %v4946_v17 = vld [vmem:[%s3664_s12 + $0xd8] sm:$0xff]  ;;  %v2572_v19 = vrot.slane %v1461_v10, %v3667_v7  ;;  %v1500_v22 = vrot.slane %v1478_v15, %v3659_v5  ;;  %v5054_v62 = vrot.slane %v5040_v58, %v3659_v5 }
  0xcc   : > { %3395 = vst.msk [vmem:[%s3696_s16 + $0x2ca] sm:$0x3] %vm3037_vm0, %v2484_v14  ;;  %3411 = vst.msk [vmem:[%s3696_s16 + $0x2ea] sm:$0x3] %vm3037_vm0, %v2484_v14  ;;  %v1444_v20 = vrot.slane %v1428_v11, %v3659_v5  ;;  %v1430_v21 = vcombine.high %v1428_v11, %v1428_v11  ;;  %v1519_v14 = vrot.slane %v4946_v17, %v3659_v5 }
  0xcd   : > { %3396 = vst.msk [vmem:[%s3696_s16 + $0x2cc] sm:$0x3] %vm3037_vm0, %v2488_v18  ;;  %3412 = vst.msk [vmem:[%s3696_s16 + $0x2ec] sm:$0x3] %vm3037_vm0, %v2488_v18  ;;  %v2592_v18 = vrot.slane %v1486_v13, %v3667_v7  ;;  %v1510_v31 = vcombine.high %v1500_v22, %v1500_v22  ;;  %v2608_v39 = vrot.slane %v1493_v32, %v3667_v7 }
  0xce   : > { %3398 = vst.msk [vmem:[%s3696_s16 + $0x2d0] sm:$0x3] %vm3037_vm0, %v2496_v23  ;;  %3414 = vst.msk [vmem:[%s3696_s16 + $0x2f0] sm:$0x3] %vm3037_vm0, %v2496_v23  ;;  %v1508_v23 = vcombine.high %v1486_v13, %v1486_v13  ;;  %v2576_v25 = vrot.slane %v1444_v20, %v3667_v7  ;;  %v1458_v26 = vrot.slane %v1430_v21, %v3659_v5 }
  0xcf   : > { %3397 = vst.msk [vmem:[%s3696_s16 + $0x2ce] sm:$0x3] %vm3037_vm0, %v2492_v29  ;;  %3413 = vst.msk [vmem:[%s3696_s16 + $0x2ee] sm:$0x3] %vm3037_vm0, %v2492_v29  ;;  %v1460_v27 = vcombine.high %v1444_v20, %v1444_v20  ;;  %v1535_v28 = vrot.slane %v1519_v14, %v3659_v5  ;;  %v2596_v29 = vrot.slane %v1500_v22, %v3667_v7 }
  0xd0   : > { %3399 = vst.msk [vmem:[%s3696_s16 + $0x2d2] sm:$0x3] %vm3037_vm0, %v2500_v33  ;;  %3415 = vst.msk [vmem:[%s3696_s16 + $0x2f2] sm:$0x3] %vm3037_vm0, %v2500_v33  ;;  %v2600_v30 = vrot.slane %v1508_v23, %v3667_v7  ;;  %v2580_v33 = vrot.slane %v1458_v26, %v3667_v7  ;;  %v1462_v35 = vcombine.high %v1458_v26, %v1458_v26 }
  0xd1   : > { %3400 = vst.msk [vmem:[%s3696_s16 + $0x2d4] sm:$0x3] %vm3037_vm0, %v2504_v34  ;;  %3416 = vst.msk [vmem:[%s3696_s16 + $0x2f4] sm:$0x3] %vm3037_vm0, %v2504_v34  ;;  %v2584_v34 = vrot.slane %v1460_v27, %v3667_v7  ;;  %v1509_v40 = vcombine.high %v1493_v32, %v1493_v32  ;;  %v1507_v43 = vrot.slane %v1479_v36, %v3659_v5 }
  0xd2   : > { %3422 = vst.msk [vmem:[%s3696_s16 + $0x300] sm:$0x3] %vm3037_vm0, %v2528_v38  ;;  %3438 = vst.msk [vmem:[%s3696_s16 + $0x320] sm:$0x3] %vm3037_vm0, %v2528_v38  ;;  %v2604_v38 = vrot.slane %v1510_v31, %v3667_v7  ;;  %v1527_v44 = vcombine.high %v1519_v14, %v1519_v14  ;;  %v1557_v45 = vcombine.high %v1535_v28, %v1535_v28 }
  0xd3   : > { %3401 = vst.msk [vmem:[%s3696_s16 + $0x2d6] sm:$0x3] %vm3037_vm0, %v2508_v41  ;;  %3417 = vst.msk [vmem:[%s3696_s16 + $0x2f6] sm:$0x3] %vm3037_vm0, %v2508_v41  ;;  %v2624_v41 = vrot.slane %v1535_v28, %v3667_v7  ;;  %v2612_v50 = vrot.slane %v1507_v43, %v3667_v7  ;;  %v1511_v51 = vcombine.high %v1507_v43, %v1507_v43 }
  0xd4   : > { %3402 = vst.msk [vmem:[%s3696_s16 + $0x2d8] sm:$0x3] %vm3037_vm0, %v2512_v42  ;;  %3418 = vst.msk [vmem:[%s3696_s16 + $0x2f8] sm:$0x3] %vm3037_vm0, %v2512_v42  ;;  %v2588_v42 = vrot.slane %v1462_v35, %v3667_v7  ;;  %v1549_v52 = vrot.slane %v1527_v44, %v3659_v5  ;;  %v1633_v24 = vrot.slane %v5054_v62, %v3659_v5 }
  0xd5   : > { %3423 = vst.msk [vmem:[%s3696_s16 + $0x302] sm:$0x3] %vm3037_vm0, %v2532_v46  ;;  %3439 = vst.msk [vmem:[%s3696_s16 + $0x322] sm:$0x3] %vm3037_vm0, %v2532_v46  ;;  %v2616_v46 = vrot.slane %v1509_v40, %v3667_v7  ;;  %v2620_v59 = vrot.slane %v1511_v51, %v3667_v7  ;;  %v1625_v28 = vcombine.high %v5054_v62, %v5054_v62 }
  0xd6   : > { %3424 = vst.msk [vmem:[%s3696_s16 + $0x304] sm:$0x3] %vm3037_vm0, %v2536_v47  ;;  %3440 = vst.msk [vmem:[%s3696_s16 + $0x324] sm:$0x3] %vm3037_vm0, %v2536_v47  ;;  %v1512_v47 = vcombine.high %v4946_v17, %v4946_v17  ;;  %v2688_v32 = vrot.slane %v1633_v24, %v3667_v7 }
  0xd7   : > { %3404 = vst.msk [vmem:[%s3696_s16 + $0x2dc] sm:$0x3] %vm3037_vm0, %v2520_v49  ;;  %3420 = vst.msk [vmem:[%s3696_s16 + $0x2fc] sm:$0x3] %vm3037_vm0, %v2520_v49  ;;  %v1561_v49 = vcombine.high %v153_v37, %v153_v37  ;;  %v1647_v35 = vrot.slane %v1625_v28, %v3659_v5 }
  0xd8   : > { %3403 = vst.msk [vmem:[%s3696_s16 + $0x2da] sm:$0x3] %vm3037_vm0, %v2516_v53  ;;  %3419 = vst.msk [vmem:[%s3696_s16 + $0x2fa] sm:$0x3] %vm3037_vm0, %v2516_v53  ;;  %v2632_v53 = vrot.slane %v1557_v45, %v3667_v7  ;;  %v1526_v54 = vrot.slane %v1512_v47, %v3659_v5 }
  0xd9   : > { %3425 = vst.msk [vmem:[%s3696_s16 + $0x306] sm:$0x3] %vm3037_vm0, %v2540_v55  ;;  %3441 = vst.msk [vmem:[%s3696_s16 + $0x326] sm:$0x3] %vm3037_vm0, %v2540_v55  ;;  %v1584_v55 = vrot.slane %v1568_v48, %v3659_v5  ;;  %v2692_v43 = vrot.slane %v1647_v35, %v3667_v7  ;;  %v1657_v44 = vcombine.high %v1647_v35, %v1647_v35 }
  0xda   : > { %3426 = vst.msk [vmem:[%s3696_s16 + $0x308] sm:$0x3] %vm3037_vm0, %v2544_v57  ;;  %3442 = vst.msk [vmem:[%s3696_s16 + $0x328] sm:$0x3] %vm3037_vm0, %v2544_v57  ;;  %v1575_v57 = vrot.slane %v1561_v49, %v3659_v5  ;;  %v1542_v63 = vrot.slane %v1526_v54, %v3659_v5  ;;  %v1528_v0 = vcombine.high %v1526_v54, %v1526_v54 }
  0xdb   : > { %3430 = vst.msk [vmem:[%s3696_s16 + $0x310] sm:$0x3] %vm3037_vm0, %v2560_v60  ;;  %3446 = vst.msk [vmem:[%s3696_s16 + $0x330] sm:$0x3] %vm3037_vm0, %v2560_v60  ;;  %v2628_v60 = vrot.slane %v1549_v52, %v3667_v7  ;;  %v2656_v1 = vrot.slane %v1584_v55, %v3667_v7  ;;  %v1606_v4 = vcombine.high %v1584_v55, %v1584_v55 }
  0xdc   : > { %3405 = vst.msk [vmem:[%s3696_s16 + $0x2de] sm:$0x3] %vm3037_vm0, %v2524_v61  ;;  %3421 = vst.msk [vmem:[%s3696_s16 + $0x2fe] sm:$0x3] %vm3037_vm0, %v2524_v61  ;;  %v1559_v61 = vcombine.high %v1549_v52, %v1549_v52  ;;  %v1591_v6 = vrot.slane %v1575_v57, %v3659_v5  ;;  %v1556_v10 = vrot.slane %v1528_v0, %v3659_v5 }
  0xdd   : > { %3427 = vst.msk [vmem:[%s3696_s16 + $0x30a] sm:$0x3] %vm3037_vm0, %v2548_v2  ;;  %3443 = vst.msk [vmem:[%s3696_s16 + $0x32a] sm:$0x3] %vm3037_vm0, %v2548_v2  ;;  %v1598_v2 = vrot.slane %v1576_v56, %v3659_v5  ;;  %v1558_v11 = vcombine.high %v1542_v63, %v1542_v63  ;;  %v2664_v13 = vrot.slane %v1606_v4, %v3667_v7 }
  0xde   : > { %3428 = vst.msk [vmem:[%s3696_s16 + $0x30c] sm:$0x3] %vm3037_vm0, %v2552_v3  ;;  %3444 = vst.msk [vmem:[%s3696_s16 + $0x32c] sm:$0x3] %vm3037_vm0, %v2552_v3  ;;  %v2636_v3 = vrot.slane %v1559_v61, %v3667_v7  ;;  %v2672_v16 = vrot.slane %v1591_v6, %v3667_v7  ;;  %v1560_v21 = vcombine.high %v1556_v10, %v1556_v10 }
  0xdf   : > { %3431 = vst.msk [vmem:[%s3696_s16 + $0x312] sm:$0x3] %vm3037_vm0, %v2564_v8  ;;  %3447 = vst.msk [vmem:[%s3696_s16 + $0x332] sm:$0x3] %vm3037_vm0, %v2564_v8  ;;  %v1577_v8 = vcombine.high %v1575_v57, %v1575_v57  ;;  %v1608_v15 = vcombine.high %v1598_v2, %v1598_v2  ;;  %v2648_v20 = vrot.slane %v1558_v11, %v3667_v7 }
  0xe0   : > { %3432 = vst.msk [vmem:[%s3696_s16 + $0x314] sm:$0x3] %vm3037_vm0, %v2568_v9  ;;  %3448 = vst.msk [vmem:[%s3696_s16 + $0x334] sm:$0x3] %vm3037_vm0, %v2568_v9  ;;  %v2640_v9 = vrot.slane %v1542_v63, %v3667_v7  ;;  %v1607_v14 = vcombine.high %v1591_v6, %v1591_v6  ;;  %v2652_v26 = vrot.slane %v1560_v21, %v3667_v7 }
  0xe1   : > { %3429 = vst.msk [vmem:[%s3696_s16 + $0x30e] sm:$0x3] %vm3037_vm0, %v2556_v12  ;;  %3445 = vst.msk [vmem:[%s3696_s16 + $0x32e] sm:$0x3] %vm3037_vm0, %v2556_v12  ;;  %v2660_v12 = vrot.slane %v1598_v2, %v3667_v7  ;;  %v1605_v17 = vrot.slane %v1577_v8, %v3659_v5  ;;  %v2700_v51 = vrot.slane %v1657_v44, %v3667_v7 }
  0xe2   : > { %3433 = vst.msk [vmem:[%s3696_s16 + $0x316] sm:$0x3] %vm3037_vm0, %v2572_v19  ;;  %3449 = vst.msk [vmem:[%s3696_s16 + $0x336] sm:$0x3] %vm3037_vm0, %v2572_v19  ;;  %v2644_v19 = vrot.slane %v1556_v10, %v3667_v7  ;;  %v2680_v27 = vrot.slane %v1607_v14, %v3667_v7 }
  0xe3   : > { %3454 = vst.msk [vmem:[%s3696_s16 + $0x340] sm:$0x3] %vm3037_vm0, %v2592_v18  ;;  %3470 = vst.msk [vmem:[%s3696_s16 + $0x360] sm:$0x3] %vm3037_vm0, %v2592_v18  ;;  %v2668_v18 = vrot.slane %v1608_v15, %v3667_v7  ;;  %v2676_v22 = vrot.slane %v1605_v17, %v3667_v7  ;;  %v1609_v23 = vcombine.high %v1605_v17, %v1605_v17 }
  0xe4   : > { %3434 = vst.msk [vmem:[%s3696_s16 + $0x318] sm:$0x3] %vm3037_vm0, %v2576_v25  ;;  %3450 = vst.msk [vmem:[%s3696_s16 + $0x338] sm:$0x3] %vm3037_vm0, %v2576_v25  ;;  %v155_v25 = vld [vmem:[%s3664_s12 + $0xf0] sm:$0xff] }
  0xe5   : > { %3455 = vst.msk [vmem:[%s3696_s16 + $0x342] sm:$0x3] %vm3037_vm0, %v2596_v29  ;;  %3471 = vst.msk [vmem:[%s3696_s16 + $0x362] sm:$0x3] %vm3037_vm0, %v2596_v29  ;;  %v1610_v29 = vcombine.high %v5040_v58, %v5040_v58  ;;  %v2684_v31 = vrot.slane %v1609_v23, %v3667_v7  ;;  %v1659_v37 = vcombine.high %v155_v25, %v155_v25 }
  0xe6   : > { %3456 = vst.msk [vmem:[%s3696_s16 + $0x344] sm:$0x3] %vm3037_vm0, %v2600_v30  ;;  %3472 = vst.msk [vmem:[%s3696_s16 + $0x364] sm:$0x3] %vm3037_vm0, %v2600_v30  ;;  %v5121_v30 = vld [vmem:[%s3664_s12 + $0xf8] sm:$0xff] }
  0xe7   : > { %3435 = vst.msk [vmem:[%s3696_s16 + $0x31a] sm:$0x3] %vm3037_vm0, %v2580_v33  ;;  %3451 = vst.msk [vmem:[%s3696_s16 + $0x33a] sm:$0x3] %vm3037_vm0, %v2580_v33  ;;  %v1655_v33 = vcombine.high %v1633_v24, %v1633_v24  ;;  %v1624_v36 = vrot.slane %v1610_v29, %v3659_v5 }
  0xe8   : > { %3436 = vst.msk [vmem:[%s3696_s16 + $0x31c] sm:$0x3] %vm3037_vm0, %v2584_v34  ;;  %3452 = vst.msk [vmem:[%s3696_s16 + $0x33c] sm:$0x3] %vm3037_vm0, %v2584_v34  ;;  %v1666_v34 = vrot.slane %v155_v25, %v3659_v5 }
  0xe9   : > { %3457 = vst.msk [vmem:[%s3696_s16 + $0x346] sm:$0x3] %vm3037_vm0, %v2604_v38  ;;  %3473 = vst.msk [vmem:[%s3696_s16 + $0x366] sm:$0x3] %vm3037_vm0, %v2604_v38  ;;  %v5146_v38 = vrot.slane %v5121_v30, %v3659_v5  ;;  %v1640_v45 = vrot.slane %v1624_v36, %v3659_v5 }
  0xea   : > { %3458 = vst.msk [vmem:[%s3696_s16 + $0x348] sm:$0x3] %vm3037_vm0, %v2608_v39  ;;  %3474 = vst.msk [vmem:[%s3696_s16 + $0x368] sm:$0x3] %vm3037_vm0, %v2608_v39  ;;  %v2696_v39 = vrot.slane %v1655_v33, %v3667_v7  ;;  %v1682_v40 = vrot.slane %v1666_v34, %v3659_v5 }
  0xeb   : > { %3462 = vst.msk [vmem:[%s3696_s16 + $0x350] sm:$0x3] %vm3037_vm0, %v2624_v41  ;;  %3478 = vst.msk [vmem:[%s3696_s16 + $0x370] sm:$0x3] %vm3037_vm0, %v2624_v41  ;;  %v1674_v41 = vcombine.high %v1666_v34, %v1666_v34  ;;  %v2704_v52 = vrot.slane %v1640_v45, %v3667_v7  ;;  %v1656_v54 = vcombine.high %v1640_v45, %v1640_v45 }
  0xec   : > { %3437 = vst.msk [vmem:[%s3696_s16 + $0x31e] sm:$0x3] %vm3037_vm0, %v2588_v42  ;;  %3453 = vst.msk [vmem:[%s3696_s16 + $0x33e] sm:$0x3] %vm3037_vm0, %v2588_v42  ;;  %v1708_v42 = vcombine.high %v5121_v30, %v5121_v30  ;;  %v2720_v47 = vrot.slane %v1682_v40, %v3667_v7  ;;  %v1704_v49 = vcombine.high %v1682_v40, %v1682_v40 }
  0xed   : > { %3460 = vst.msk [vmem:[%s3696_s16 + $0x34c] sm:$0x3] %vm3037_vm0, %v2616_v46  ;;  %3476 = vst.msk [vmem:[%s3696_s16 + $0x36c] sm:$0x3] %vm3037_vm0, %v2616_v46  ;;  %v1626_v46 = vcombine.high %v1624_v36, %v1624_v36  ;;  %v1696_v48 = vrot.slane %v1674_v41, %v3659_v5  ;;  %v1731_v2 = vrot.slane %v5146_v38, %v3659_v5 }
  0xee   : > { %3459 = vst.msk [vmem:[%s3696_s16 + $0x34a] sm:$0x3] %vm3037_vm0, %v2612_v50  ;;  %3475 = vst.msk [vmem:[%s3696_s16 + $0x36a] sm:$0x3] %vm3037_vm0, %v2612_v50  ;;  %v1673_v50 = vrot.slane %v1659_v37, %v3659_v5  ;;  %v2728_v56 = vrot.slane %v1704_v49, %v3667_v7  ;;  %v1723_v6 = vcombine.high %v5146_v38, %v5146_v38 }
  0xef   : > { %3464 = vst.msk [vmem:[%s3696_s16 + $0x354] sm:$0x3] %vm3037_vm0, %v2632_v53  ;;  %3480 = vst.msk [vmem:[%s3696_s16 + $0x374] sm:$0x3] %vm3037_vm0, %v2632_v53  ;;  %v1654_v53 = vrot.slane %v1626_v46, %v3659_v5  ;;  %v2724_v55 = vrot.slane %v1696_v48, %v3667_v7  ;;  %v1706_v57 = vcombine.high %v1696_v48, %v1696_v48 }
  0xf0   : > { %3461 = vst.msk [vmem:[%s3696_s16 + $0x34e] sm:$0x3] %vm3037_vm0, %v2620_v59  ;;  %3477 = vst.msk [vmem:[%s3696_s16 + $0x36e] sm:$0x3] %vm3037_vm0, %v2620_v59  ;;  %v1689_v58 = vrot.slane %v1673_v50, %v3659_v5  ;;  %v1675_v62 = vcombine.high %v1673_v50, %v1673_v50  ;;  %v1722_v8 = vrot.slane %v1708_v42, %v3659_v5 }
  0xf1   : > { %3463 = vst.msk [vmem:[%s3696_s16 + $0x352] sm:$0x3] %vm3037_vm0, %v2628_v60  ;;  %3479 = vst.msk [vmem:[%s3696_s16 + $0x372] sm:$0x3] %vm3037_vm0, %v2628_v60  ;;  %v2708_v59 = vrot.slane %v1654_v53, %v3667_v7  ;;  %v2712_v60 = vrot.slane %v1656_v54, %v3667_v7  ;;  %v1658_v61 = vcombine.high %v1654_v53, %v1654_v53 }
  0xf2   : > { %3486 = vst.msk [vmem:[%s3696_s16 + $0x380] sm:$0x3] %vm3037_vm0, %v2656_v1  ;;  %3502 = vst.msk [vmem:[%s3696_s16 + $0x3a0] sm:$0x3] %vm3037_vm0, %v2656_v1  ;;  %v2732_v63 = vrot.slane %v1706_v57, %v3667_v7  ;;  %v2736_v0 = vrot.slane %v1689_v58, %v3667_v7  ;;  %v1705_v1 = vcombine.high %v1689_v58, %v1689_v58 }
  0xf3   : > { %3465 = vst.msk [vmem:[%s3696_s16 + $0x356] sm:$0x3] %vm3037_vm0, %v2636_v3  ;;  %3481 = vst.msk [vmem:[%s3696_s16 + $0x376] sm:$0x3] %vm3037_vm0, %v2636_v3  ;;  %v2716_v3 = vrot.slane %v1658_v61, %v3667_v7  ;;  %v1703_v4 = vrot.slane %v1675_v62, %v3659_v5  ;;  %v2752_v10 = vrot.slane %v1731_v2, %v3667_v7 }
  0xf4   : > { %3466 = vst.msk [vmem:[%s3696_s16 + $0x358] sm:$0x3] %vm3037_vm0, %v2640_v9  ;;  %3482 = vst.msk [vmem:[%s3696_s16 + $0x378] sm:$0x3] %vm3037_vm0, %v2640_v9  ;;  %v2744_v9 = vrot.slane %v1705_v1, %v3667_v7  ;;  %v1753_v11 = vcombine.high %v1731_v2, %v1731_v2  ;;  %v1745_v15 = vrot.slane %v1723_v6, %v3659_v5 }
  0xf5   : > { %3487 = vst.msk [vmem:[%s3696_s16 + $0x382] sm:$0x3] %vm3037_vm0, %v2660_v12  ;;  %3503 = vst.msk [vmem:[%s3696_s16 + $0x3a2] sm:$0x3] %vm3037_vm0, %v2660_v12  ;;  %v2740_v12 = vrot.slane %v1703_v4, %v3667_v7 }
  0xf6   : > { %3488 = vst.msk [vmem:[%s3696_s16 + $0x384] sm:$0x3] %vm3037_vm0, %v2664_v13  ;;  %3504 = vst.msk [vmem:[%s3696_s16 + $0x3a4] sm:$0x3] %vm3037_vm0, %v2664_v13  ;;  %v1707_v13 = vcombine.high %v1703_v4, %v1703_v4  ;;  %v2760_v17 = vrot.slane %v1753_v11, %v3667_v7  ;;  %v2756_v21 = vrot.slane %v1745_v15, %v3667_v7 }
  0xf7   : > { %3490 = vst.msk [vmem:[%s3696_s16 + $0x388] sm:$0x3] %vm3037_vm0, %v2672_v16  ;;  %3506 = vst.msk [vmem:[%s3696_s16 + $0x3a8] sm:$0x3] %vm3037_vm0, %v2672_v16  ;;  %v1738_v16 = vrot.slane %v1722_v8, %v3659_v5  ;;  %v1755_v14 = vcombine.high %v1745_v15, %v1745_v15 }
  0xf8   : > { %3467 = vst.msk [vmem:[%s3696_s16 + $0x35a] sm:$0x3] %vm3037_vm0, %v2644_v19  ;;  %3483 = vst.msk [vmem:[%s3696_s16 + $0x37a] sm:$0x3] %vm3037_vm0, %v2644_v19  ;;  %v1724_v19 = vcombine.high %v1722_v8, %v1722_v8 }
  0xf9   : > { %3468 = vst.msk [vmem:[%s3696_s16 + $0x35c] sm:$0x3] %vm3037_vm0, %v2648_v20  ;;  %3484 = vst.msk [vmem:[%s3696_s16 + $0x37c] sm:$0x3] %vm3037_vm0, %v2648_v20  ;;  %v2748_v20 = vrot.slane %v1707_v13, %v3667_v7  ;;  %v1754_v23 = vcombine.high %v1738_v16, %v1738_v16  ;;  %v2764_v24 = vrot.slane %v1755_v14, %v3667_v7 }
  0xfa   : > { %3489 = vst.msk [vmem:[%s3696_s16 + $0x386] sm:$0x3] %vm3037_vm0, %v2668_v18  ;;  %3505 = vst.msk [vmem:[%s3696_s16 + $0x3a6] sm:$0x3] %vm3037_vm0, %v2668_v18  ;;  %v2768_v18 = vrot.slane %v1738_v16, %v3667_v7 }
  0xfb   : > { %3491 = vst.msk [vmem:[%s3696_s16 + $0x38a] sm:$0x3] %vm3037_vm0, %v2676_v22  ;;  %3507 = vst.msk [vmem:[%s3696_s16 + $0x3aa] sm:$0x3] %vm3037_vm0, %v2676_v22  ;;  %v1752_v22 = vrot.slane %v1724_v19, %v3659_v5  ;;  %v2776_v25 = vrot.slane %v1754_v23, %v3667_v7 }
  0xfc   : > { %3469 = vst.msk [vmem:[%s3696_s16 + $0x35e] sm:$0x3] %vm3037_vm0, %v2652_v26  ;;  %3485 = vst.msk [vmem:[%s3696_s16 + $0x37e] sm:$0x3] %vm3037_vm0, %v2652_v26 }
  0xfd   : > { %3492 = vst.msk [vmem:[%s3696_s16 + $0x38c] sm:$0x3] %vm3037_vm0, %v2680_v27  ;;  %3508 = vst.msk [vmem:[%s3696_s16 + $0x3ac] sm:$0x3] %vm3037_vm0, %v2680_v27  ;;  %v2772_v5 = vrot.slane %v1752_v22, %v3667_v7  ;;  %v1756_v26 = vcombine.high %v1752_v22, %v1752_v22 }
  0xfe   : > { %3493 = vst.msk [vmem:[%s3696_s16 + $0x38e] sm:$0x3] %vm3037_vm0, %v2684_v31  ;;  %3509 = vst.msk [vmem:[%s3696_s16 + $0x3ae] sm:$0x3] %vm3037_vm0, %v2684_v31 }
  0xff   : > { %3494 = vst.msk [vmem:[%s3696_s16 + $0x390] sm:$0x3] %vm3037_vm0, %v2688_v32  ;;  %3510 = vst.msk [vmem:[%s3696_s16 + $0x3b0] sm:$0x3] %vm3037_vm0, %v2688_v32  ;;  %v2780_v27 = vrot.slane %v1756_v26, %v3667_v7 }
 0x100   : > { %3496 = vst.msk [vmem:[%s3696_s16 + $0x394] sm:$0x3] %vm3037_vm0, %v2696_v39  ;;  %3512 = vst.msk [vmem:[%s3696_s16 + $0x3b4] sm:$0x3] %vm3037_vm0, %v2696_v39 }
 0x101   : > { %3495 = vst.msk [vmem:[%s3696_s16 + $0x392] sm:$0x3] %vm3037_vm0, %v2692_v43  ;;  %3511 = vst.msk [vmem:[%s3696_s16 + $0x3b2] sm:$0x3] %vm3037_vm0, %v2692_v43 }
 0x102   : > { %3518 = vst.msk [vmem:[%s3696_s16 + $0x3c0] sm:$0x3] %vm3037_vm0, %v2720_v47  ;;  %3534 = vst.msk [vmem:[%s3696_s16 + $0x3e0] sm:$0x3] %vm3037_vm0, %v2720_v47 }
 0x103   : > { %3497 = vst.msk [vmem:[%s3696_s16 + $0x396] sm:$0x3] %vm3037_vm0, %v2700_v51  ;;  %3513 = vst.msk [vmem:[%s3696_s16 + $0x3b6] sm:$0x3] %vm3037_vm0, %v2700_v51 }
 0x104   : > { %3498 = vst.msk [vmem:[%s3696_s16 + $0x398] sm:$0x3] %vm3037_vm0, %v2704_v52  ;;  %3514 = vst.msk [vmem:[%s3696_s16 + $0x3b8] sm:$0x3] %vm3037_vm0, %v2704_v52 }
 0x105   : > { %3519 = vst.msk [vmem:[%s3696_s16 + $0x3c2] sm:$0x3] %vm3037_vm0, %v2724_v55  ;;  %3535 = vst.msk [vmem:[%s3696_s16 + $0x3e2] sm:$0x3] %vm3037_vm0, %v2724_v55 }
 0x106   : > { %3520 = vst.msk [vmem:[%s3696_s16 + $0x3c4] sm:$0x3] %vm3037_vm0, %v2728_v56  ;;  %3536 = vst.msk [vmem:[%s3696_s16 + $0x3e4] sm:$0x3] %vm3037_vm0, %v2728_v56 }
 0x107   : > { %3499 = vst.msk [vmem:[%s3696_s16 + $0x39a] sm:$0x3] %vm3037_vm0, %v2708_v59  ;;  %3515 = vst.msk [vmem:[%s3696_s16 + $0x3ba] sm:$0x3] %vm3037_vm0, %v2708_v59 }
 0x108   : > { %3500 = vst.msk [vmem:[%s3696_s16 + $0x39c] sm:$0x3] %vm3037_vm0, %v2712_v60  ;;  %3516 = vst.msk [vmem:[%s3696_s16 + $0x3bc] sm:$0x3] %vm3037_vm0, %v2712_v60 }
 0x109   : > { %3521 = vst.msk [vmem:[%s3696_s16 + $0x3c6] sm:$0x3] %vm3037_vm0, %v2732_v63  ;;  %3537 = vst.msk [vmem:[%s3696_s16 + $0x3e6] sm:$0x3] %vm3037_vm0, %v2732_v63 }
 0x10a   : > { %3522 = vst.msk [vmem:[%s3696_s16 + $0x3c8] sm:$0x3] %vm3037_vm0, %v2736_v0  ;;  %3538 = vst.msk [vmem:[%s3696_s16 + $0x3e8] sm:$0x3] %vm3037_vm0, %v2736_v0 }
 0x10b   : > { %3501 = vst.msk [vmem:[%s3696_s16 + $0x39e] sm:$0x3] %vm3037_vm0, %v2716_v3  ;;  %3517 = vst.msk [vmem:[%s3696_s16 + $0x3be] sm:$0x3] %vm3037_vm0, %v2716_v3 }
 0x10c   : > { %3524 = vst.msk [vmem:[%s3696_s16 + $0x3cc] sm:$0x3] %vm3037_vm0, %v2744_v9  ;;  %3540 = vst.msk [vmem:[%s3696_s16 + $0x3ec] sm:$0x3] %vm3037_vm0, %v2744_v9 }
 0x10d   : > { %3526 = vst.msk [vmem:[%s3696_s16 + $0x3d0] sm:$0x3] %vm3037_vm0, %v2752_v10  ;;  %3542 = vst.msk [vmem:[%s3696_s16 + $0x3f0] sm:$0x3] %vm3037_vm0, %v2752_v10 }
 0x10e   : > { %3523 = vst.msk [vmem:[%s3696_s16 + $0x3ca] sm:$0x3] %vm3037_vm0, %v2740_v12  ;;  %3539 = vst.msk [vmem:[%s3696_s16 + $0x3ea] sm:$0x3] %vm3037_vm0, %v2740_v12 }
 0x10f   : > { %3528 = vst.msk [vmem:[%s3696_s16 + $0x3d4] sm:$0x3] %vm3037_vm0, %v2760_v17  ;;  %3544 = vst.msk [vmem:[%s3696_s16 + $0x3f4] sm:$0x3] %vm3037_vm0, %v2760_v17 }
 0x110   : > { %3525 = vst.msk [vmem:[%s3696_s16 + $0x3ce] sm:$0x3] %vm3037_vm0, %v2748_v20  ;;  %3541 = vst.msk [vmem:[%s3696_s16 + $0x3ee] sm:$0x3] %vm3037_vm0, %v2748_v20 }
 0x111   : > { %3527 = vst.msk [vmem:[%s3696_s16 + $0x3d2] sm:$0x3] %vm3037_vm0, %v2756_v21  ;;  %3543 = vst.msk [vmem:[%s3696_s16 + $0x3f2] sm:$0x3] %vm3037_vm0, %v2756_v21 }
 0x112   : > { %3530 = vst.msk [vmem:[%s3696_s16 + $0x3d8] sm:$0x3] %vm3037_vm0, %v2768_v18  ;;  %3546 = vst.msk [vmem:[%s3696_s16 + $0x3f8] sm:$0x3] %vm3037_vm0, %v2768_v18 }
 0x113   : > { %3529 = vst.msk [vmem:[%s3696_s16 + $0x3d6] sm:$0x3] %vm3037_vm0, %v2764_v24  ;;  %3545 = vst.msk [vmem:[%s3696_s16 + $0x3f6] sm:$0x3] %vm3037_vm0, %v2764_v24 }
 0x114   : > { %3531 = vst.msk [vmem:[%s3696_s16 + $0x3da] sm:$0x3] %vm3037_vm0, %v2772_v5  ;;  %3547 = vst.msk [vmem:[%s3696_s16 + $0x3fa] sm:$0x3] %vm3037_vm0, %v2772_v5 }
 0x115   : > { %3532 = vst.msk [vmem:[%s3696_s16 + $0x3dc] sm:$0x3] %vm3037_vm0, %v2776_v25  ;;  %3548 = vst.msk [vmem:[%s3696_s16 + $0x3fc] sm:$0x3] %vm3037_vm0, %v2776_v25 }
 0x116   : > { %3533 = vst.msk [vmem:[%s3696_s16 + $0x3de] sm:$0x3] %vm3037_vm0, %v2780_v27  ;;  %3549 = vst.msk [vmem:[%s3696_s16 + $0x3fe] sm:$0x3] %vm3037_vm0, %v2780_v27 }
 0x117 PF: > { %s11_s6 = sadd.s32 1, %s3638_s6  }
 0x118   : > { %p8_p4 = scmp.ge.s32.totalorder %s11_s6, 4  }
 0x11a   :  { %10 = sbr.rel (!%p8_p4) target bundleno = 1 (0x1), region = 54 }

</bundles_post_ra>
